<compile_context>
chip_gen: v7x
topology: tpu7x:2x2x1
jax: 0.10.0
libtpu: 0.0.40
codegen_flags: <defaults>
</compile_context>

<pallas_src>
import jax
import jax.numpy as jnp
from jax.experimental import pallas as pl
from jax.experimental.pallas import tpu as pltpu

# --- config (mirrors the PyTorch `config` class) ---
CRITIC_INPUT_SIZE = 4
HIDDEN = 512
HIDDEN2 = 256
OUTPUT_SIZE = 1
INIT_W = 0.001

_MXU_K = 128  # padded contraction width for the layer-1 MXU path


def _round_up(x, m):
    return ((x + m - 1) // m) * m


def _prefer_mxu_layer1():
    """Layer 1 on the MXU pays off on v6e/v7x (idle 900+ TF/s MXU while the
    kernel is VALU-bound); on v5e the 197 TF/s MXU would become the new
    bottleneck, so keep the VPU broadcast-MAC path there."""
    try:
        kind = jax.devices()[0].device_kind.lower()
    except Exception:
        return True
    return not any(t in kind for t in ("v5e", "v5 lite", "v5lite"))


def _choose_tile(batch, tile_m):
    """Batch tile (multiple of 8). Prefers >=2 grid steps so both v7x
    TensorCores get work; otherwise uses the largest tile (<= tile_m)."""
    b8 = _round_up(max(batch, 1), 8)
    if b8 <= 2 * tile_m:
        tm = _round_up(pl.cdiv(b8, 2), 8)
    else:
        tm = tile_m
    b_pad = _round_up(b8, tm)
    return tm, b_pad


# -------------------- kernels --------------------

def critic_kernel_mxu(x_ref, w1p_ref, b1_ref, w2_ref, b2_ref, w3_ref, b3_ref,
                      o_ref, xp_ref):
    """v6e / v7x path: layer 1 on the MXU via a zero-padded (tm, 128) lhs."""
    # ---- Layer 1: Linear(4 -> 512) + ReLU on the MXU.
    # Zero the padded-x scratch and drop the real 4 features into lanes 0..3.
    xp_ref[...] = jnp.zeros_like(xp_ref)
    xp_ref[:, 0:CRITIC_INPUT_SIZE] = x_ref[...].astype(jnp.bfloat16)
    h1 = jnp.dot(xp_ref[...], w1p_ref[...],
                 preferred_element_type=jnp.float32)          # (tm, 512) f32
    h1 = jnp.maximum(h1 + b1_ref[...], 0.0)

    # ---- Layer 2: Linear(512 -> 256) + Tanh. bf16 MXU operands, f32 acc;
    # bias add and tanh stay in f32 (EUP).
    h2 = jnp.dot(h1.astype(jnp.bfloat16), w2_ref[...],
                 preferred_element_type=jnp.float32)          # (tm, 256) f32
    h2 = jnp.tanh(h2 + b2_ref[...])

    # ---- Layer 3: Linear(256 -> 1) as VPU multiply + cross-lane reduce (XLU);
    # b3 is a scalar read from SMEM.
    out = jnp.sum(h2 * w3_ref[...], axis=-1, keepdims=True) + b3_ref[0]
    o_ref[...] = out.astype(o_ref.dtype)                      # (tm, 1)


def critic_kernel_vpu(x_ref, w1_ref, b1_ref, w2_ref, b2_ref, w3_ref, b3_ref,
                      o_ref):
    """v5e path: layer 1 stays on the VPU (K=4 broadcast multiply-adds),
    weights consumed directly in f32 (no per-step casts)."""
    x = x_ref[...]                                            # (tm, 4)  f32
    w1 = w1_ref[...]                                          # (4, 512) f32
    h1 = x[:, 0:1] * w1[0:1, :]
    for k in range(1, CRITIC_INPUT_SIZE):                     # static unroll
        h1 = h1 + x[:, k:k + 1] * w1[k:k + 1, :]
    h1 = jnp.maximum(h1 + b1_ref[...], 0.0)                   # (tm, 512) f32

    h2 = jnp.dot(h1.astype(jnp.bfloat16), w2_ref[...],
                 preferred_element_type=jnp.float32)          # (tm, 256) f32
    h2 = jnp.tanh(h2 + b2_ref[...])

    out = jnp.sum(h2 * w3_ref[...], axis=-1, keepdims=True) + b3_ref[0]
    o_ref[...] = out.astype(o_ref.dtype)                      # (tm, 1)


# -------------------- wrapper --------------------

def critic_forward(x, params, *, tile_m=2048, use_mxu_l1=None):
    """x: (B, 4) float32. Returns (B, 1) float32."""
    if use_mxu_l1 is None:
        use_mxu_l1 = _prefer_mxu_layer1()

    B = x.shape[0]
    tm, b_pad = _choose_tile(B, tile_m)
    if b_pad != B:                              # pad batch to whole tiles
        x = jnp.pad(x, ((0, b_pad - B), (0, 0)))
    grid = (b_pad // tm,)

    # Weights/biases: block index pinned to (0, 0) -> VMEM-resident, no re-fetch.
    def resident(arr):
        return pl.BlockSpec(arr.shape, lambda i: (0, 0))

    w1 = params["w1p"] if use_mxu_l1 else params["w1"]
    kernel = critic_kernel_mxu if use_mxu_l1 else critic_kernel_vpu
    scratch = ([pltpu.VMEM((tm, _MXU_K), jnp.bfloat16)] if use_mxu_l1 else [])

    out = pl.pallas_call(
        kernel,
        out_shape=jax.ShapeDtypeStruct((b_pad, OUTPUT_SIZE), jnp.float32),
        grid=grid,
        in_specs=[
            pl.BlockSpec((tm, CRITIC_INPUT_SIZE), lambda i: (i, 0)),  # x tile
            resident(w1), resident(params["b1"]),
            resident(params["w2"]), resident(params["b2"]),
            resident(params["w3"]),
            pl.BlockSpec(memory_space=pltpu.MemorySpace.SMEM),        # b3 scalar
        ],
        out_specs=pl.BlockSpec((tm, OUTPUT_SIZE), lambda i: (i, 0)),
        scratch_shapes=scratch,
        compiler_params=pltpu.CompilerParams(
            dimension_semantics=("parallel",),        # v7x megacore sharding
            vmem_limit_bytes=48 * 1024 * 1024),       # safe on v7x's 64 MiB VMEM
    )(x, w1, params["b1"], params["w2"], params["b2"], params["w3"],
      params["b3"])

    return out[:B]


# -------------------- params / reference --------------------

def init_params(key):
    """Torch defaults (uniform +/- 1/sqrt(fan_in)); layer 3 uses
    uniform(-init_w, init_w). MXU operands (padded w1, w2) stored in bf16;
    VPU-consumed tensors stay f32."""
    k1, k2, k3, k4, k5, k6 = jax.random.split(key, 6)

    def u(k, shape, bound):
        return jax.random.uniform(k, shape, jnp.float32, -bound, bound)

    bnd1 = 1.0 / (CRITIC_INPUT_SIZE ** 0.5)
    bnd2 = 1.0 / (HIDDEN ** 0.5)
    w1 = u(k1, (CRITIC_INPUT_SIZE, HIDDEN), bnd1)               # f32, (in, out)
    w1p = (jnp.zeros((_MXU_K, HIDDEN), jnp.bfloat16)
           .at[:CRITIC_INPUT_SIZE].set(w1.astype(jnp.bfloat16)))  # K-padded bf16
    return {
        "w1": w1, "w1p": w1p,
        "b1": u(k2, (1, HIDDEN), bnd1),
        "w2": u(k3, (HIDDEN, HIDDEN2), bnd2).astype(jnp.bfloat16),
        "b2": u(k4, (1, HIDDEN2), bnd2),
        "w3": u(k5, (OUTPUT_SIZE, HIDDEN2), INIT_W),            # f32, (out, in)
        "b3": u(k6, (OUTPUT_SIZE,), INIT_W),
    }


def critic_reference(x, p, *, use_mxu_l1=True):
    """Pure-JAX reference mirroring the kernel's numerics (bf16 MXU operands,
    f32 accumulation) so tolerances stay tight."""
    if use_mxu_l1:
        h1 = jnp.dot(x.astype(jnp.bfloat16), p["w1"].astype(jnp.bfloat16),
                     preferred_element_type=jnp.float32) + p["b1"]
    else:
        h1 = x @ p["w1"] + p["b1"]
    h1 = jnp.maximum(h1, 0.0)
    h2 = jnp.tanh(jnp.dot(h1.astype(jnp.bfloat16), p["w2"],
                          preferred_element_type=jnp.float32) + p["b2"])
    return h2 @ p["w3"].T + p["b3"]


if __name__ == "__main__":
    key = jax.random.PRNGKey(0)
    pkey, xkey = jax.random.split(key)

    params = init_params(pkey)
    B = 256  # small batch; splits into a 2-step "parallel" pipelined grid
    x = jax.random.normal(xkey, (B, CRITIC_INPUT_SIZE), jnp.float32)

    # Exercise both generation-specific paths (MXU layer-1 for v6e/v7x,
    # VPU layer-1 for v5e); both compile on any TPU generation.
    for use_mxu in (True, False):
        out = jax.block_until_ready(
            critic_forward(x, params, tile_m=2048, use_mxu_l1=use_mxu))
        ref = critic_reference(x, params, use_mxu_l1=use_mxu)
        assert out.shape == (B, OUTPUT_SIZE)
        assert jnp.allclose(out, ref, atol=2e-3, rtol=2e-3), \
            f"mismatch vs reference (use_mxu_l1={use_mxu})"

    # Auto-detected path for the local chip (what a real caller would use).
    _ = jax.block_until_ready(critic_forward(x, params))

    print("KERNEL_OK")
</pallas_src>

<mosaic_0001>
module attributes {stable_mosaic.version = 11 : i64} {
  func.func @critic_kernel_mxu(%arg0: i32, %arg1: memref<128x4xf32, #tpu.memory_space<vmem>>, %arg2: memref<128x512xbf16, #tpu.memory_space<vmem>>, %arg3: memref<1x512xf32, #tpu.memory_space<vmem>>, %arg4: memref<512x256xbf16, #tpu.memory_space<vmem>>, %arg5: memref<1x256xf32, #tpu.memory_space<vmem>>, %arg6: memref<1x256xf32, #tpu.memory_space<vmem>>, %arg7: memref<1xf32, #tpu.memory_space<smem>>, %arg8: memref<128x1xf32, #tpu.memory_space<vmem>>, %arg9: memref<128x128xbf16, #tpu.memory_space<vmem>>) attributes {dimension_semantics = [#tpu.dimension_semantics<parallel>], iteration_bounds = array<i64: 2>, scalar_prefetch = 0 : i64, scratch_operands = 1 : i64, tpu.core_type = #tpu.core_type<tc>, window_params = [{transform_indices = @transform_0, window_bounds = array<i64: 128, 4>}, {pipeline_mode = #tpu.pipeline_mode<synchronous>, transform_indices = @transform_1, window_bounds = array<i64: 128, 512>}, {pipeline_mode = #tpu.pipeline_mode<synchronous>, transform_indices = @transform_2, window_bounds = array<i64: 1, 512>}, {pipeline_mode = #tpu.pipeline_mode<synchronous>, transform_indices = @transform_3, window_bounds = array<i64: 512, 256>}, {pipeline_mode = #tpu.pipeline_mode<synchronous>, transform_indices = @transform_4, window_bounds = array<i64: 1, 256>}, {pipeline_mode = #tpu.pipeline_mode<synchronous>, transform_indices = @transform_5, window_bounds = array<i64: 1, 256>}, {transform_indices = @transform_6, window_bounds = array<i64: 1>}, {transform_indices = @transform_7, window_bounds = array<i64: 128, 1>}]} {
    %cst = arith.constant 0.000000e+00 : bf16
    %0 = vector.broadcast %cst : bf16 to vector<128x128xbf16>
    %c0 = arith.constant 0 : index
    %c0_0 = arith.constant 0 : index
    %1 = vector.load %arg9[%c0, %c0_0] : memref<128x128xbf16, #tpu.memory_space<vmem>>, vector<128x128xbf16>
    tpu.vector_store %arg9[%c0, %c0_0], %0 {strides = array<i32>} : memref<128x128xbf16, #tpu.memory_space<vmem>>, vector<128x128xbf16>,
    %c0_1 = arith.constant 0 : index
    %c0_2 = arith.constant 0 : index
    %2 = vector.load %arg1[%c0_1, %c0_2] : memref<128x4xf32, #tpu.memory_space<vmem>>, vector<128x4xf32>
    %3 = arith.truncf %2 : vector<128x4xf32> to vector<128x4xbf16>
    %c0_3 = arith.constant 0 : index
    %c0_4 = arith.constant 0 : index
    %4 = vector.load %arg9[%c0_3, %c0_4] : memref<128x128xbf16, #tpu.memory_space<vmem>>, vector<128x4xbf16>
    tpu.vector_store %arg9[%c0_3, %c0_4], %3 {strides = array<i32>} : memref<128x128xbf16, #tpu.memory_space<vmem>>, vector<128x4xbf16>,
    %c0_5 = arith.constant 0 : index
    %c0_6 = arith.constant 0 : index
    %5 = vector.load %arg9[%c0_5, %c0_6] : memref<128x128xbf16, #tpu.memory_space<vmem>>, vector<128x128xbf16>
    %c0_7 = arith.constant 0 : index
    %c0_8 = arith.constant 0 : index
    %6 = vector.load %arg2[%c0_7, %c0_8] : memref<128x512xbf16, #tpu.memory_space<vmem>>, vector<128x512xbf16>
    %cst_9 = arith.constant dense<0.000000e+00> : vector<128x512xf32>
    %7 = tpu.matmul %5, %6, %cst_9 {dimension_numbers = #tpu.dot_dimension_numbers<[1], [0], [0], [1], [0, 0, 1, 1], [], []>} : vector<128x128xbf16>, vector<128x512xbf16>, vector<128x512xf32> -> vector<128x512xf32>
    %c0_10 = arith.constant 0 : index
    %c0_11 = arith.constant 0 : index
    %8 = vector.load %arg3[%c0_10, %c0_11] : memref<1x512xf32, #tpu.memory_space<vmem>>, vector<1x512xf32>
    %9 = vector.broadcast %8 : vector<1x512xf32> to vector<128x512xf32>
    %10 = arith.addf %7, %9 : vector<128x512xf32>
    %cst_12 = arith.constant 0.000000e+00 : f32
    %11 = vector.broadcast %cst_12 : f32 to vector<128x512xf32>
    %12 = arith.maximumf %10, %11 : vector<128x512xf32>
    %13 = arith.truncf %12 : vector<128x512xf32> to vector<128x512xbf16>
    %c0_13 = arith.constant 0 : index
    %c0_14 = arith.constant 0 : index
    %14 = vector.load %arg4[%c0_13, %c0_14] : memref<512x256xbf16, #tpu.memory_space<vmem>>, vector<512x256xbf16>
    %cst_15 = arith.constant dense<0.000000e+00> : vector<128x256xf32>
    %15 = tpu.matmul %13, %14, %cst_15 {dimension_numbers = #tpu.dot_dimension_numbers<[1], [0], [0], [1], [0, 0, 1, 1], [], []>} : vector<128x512xbf16>, vector<512x256xbf16>, vector<128x256xf32> -> vector<128x256xf32>
    %c0_16 = arith.constant 0 : index
    %c0_17 = arith.constant 0 : index
    %16 = vector.load %arg5[%c0_16, %c0_17] : memref<1x256xf32, #tpu.memory_space<vmem>>, vector<1x256xf32>
    %17 = vector.broadcast %16 : vector<1x256xf32> to vector<128x256xf32>
    %18 = arith.addf %15, %17 : vector<128x256xf32>
    %19 = math.tanh %18 : vector<128x256xf32>
    %c0_18 = arith.constant 0 : index
    %c0_19 = arith.constant 0 : index
    %20 = vector.load %arg6[%c0_18, %c0_19] : memref<1x256xf32, #tpu.memory_space<vmem>>, vector<1x256xf32>
    %21 = vector.broadcast %20 : vector<1x256xf32> to vector<128x256xf32>
    %22 = arith.mulf %19, %21 : vector<128x256xf32>
    %cst_20 = arith.constant dense<0.000000e+00> : vector<128xf32>
    %23 = vector.multi_reduction <add>, %22, %cst_20 [1] : vector<128x256xf32> to vector<128xf32>
    %24 = vector.shape_cast %23 : vector<128xf32> to vector<128x1xf32>
    %c0_21 = arith.constant 0 : index
    %25 = memref.load %arg7[%c0_21] : memref<1xf32, #tpu.memory_space<smem>>
    %26 = vector.broadcast %25 : f32 to vector<128x1xf32>
    %27 = arith.addf %24, %26 : vector<128x1xf32>
    %c0_22 = arith.constant 0 : index
    %c0_23 = arith.constant 0 : index
    %28 = vector.load %arg8[%c0_22, %c0_23] : memref<128x1xf32, #tpu.memory_space<vmem>>, vector<128x1xf32>
    tpu.vector_store %arg8[%c0_22, %c0_23], %27 {strides = array<i32>} : memref<128x1xf32, #tpu.memory_space<vmem>>, vector<128x1xf32>,
    return
  }
  func.func @transform_0(%arg0: i32) -> (i32, i32) {
    %c0_i32 = arith.constant 0 : i32
    %c0_i32_0 = arith.constant 0 : i32
    return %arg0, %c0_i32 : i32, i32
  }
  func.func @transform_1(%arg0: i32) -> (i32, i32) {
    %c0_i32 = arith.constant 0 : i32
    %c0_i32_0 = arith.constant 0 : i32
    %c0_i32_1 = arith.constant 0 : i32
    return %c0_i32, %c0_i32_0 : i32, i32
  }
  func.func @transform_2(%arg0: i32) -> (i32, i32) {
    %c0_i32 = arith.constant 0 : i32
    %c0_i32_0 = arith.constant 0 : i32
    %c0_i32_1 = arith.constant 0 : i32
    return %c0_i32, %c0_i32_0 : i32, i32
  }
  func.func @transform_3(%arg0: i32) -> (i32, i32) {
    %c0_i32 = arith.constant 0 : i32
    %c0_i32_0 = arith.constant 0 : i32
    %c0_i32_1 = arith.constant 0 : i32
    return %c0_i32, %c0_i32_0 : i32, i32
  }
  func.func @transform_4(%arg0: i32) -> (i32, i32) {
    %c0_i32 = arith.constant 0 : i32
    %c0_i32_0 = arith.constant 0 : i32
    %c0_i32_1 = arith.constant 0 : i32
    return %c0_i32, %c0_i32_0 : i32, i32
  }
  func.func @transform_5(%arg0: i32) -> (i32, i32) {
    %c0_i32 = arith.constant 0 : i32
    %c0_i32_0 = arith.constant 0 : i32
    %c0_i32_1 = arith.constant 0 : i32
    return %c0_i32, %c0_i32_0 : i32, i32
  }
  func.func @transform_6(%arg0: i32) -> i32 {
    %c0_i32 = arith.constant 0 : i32
    %c0_i32_0 = arith.constant 0 : i32
    return %c0_i32 : i32
  }
  func.func @transform_7(%arg0: i32) -> (i32, i32) {
    %c0_i32 = arith.constant 0 : i32
    %c0_i32_0 = arith.constant 0 : i32
    return %arg0, %c0_i32 : i32, i32
  }
}

</mosaic_0001>

<bundles_post_ra>
// kernel: tpu_custom_call.1
= control target key start
LH: loop header
LB: loop body
LE: loop exit
PB: predicated region body
PF: predicated region fallthrough
CT: control target
= control target key end

     0   :  { %s2632_s0 = inlined_call_operand.vmem [shape: f32[256,4], index: 0, kind: input, shape index: {}]   ;;  %s2633_s1 = inlined_call_operand.vmem [shape: bf16[128,512], index: 1, kind: input, shape index: {}]   ;;  %s2634_s2 = inlined_call_operand.vmem [shape: f32[1,512], index: 2, kind: input, shape index: {}]   ;;  %s2635_s3 = inlined_call_operand.hbm [shape: bf16[512,256], index: 3, kind: input, shape index: {}]   ;;  %s2636_s4 = inlined_call_operand.vmem [shape: f32[1,256], index: 4, kind: input, shape index: {}]   ;;  %s2637_s5 = inlined_call_operand.vmem [shape: f32[1,256], index: 5, kind: input, shape index: {}]   ;;  %s2638_s6 = inlined_call_operand.<no memory space> [shape: f32[1], index: 6, kind: input, shape index: {}]   ;;  %s2639_s7 = inlined_call_operand.vmem [shape: f32[256,1], index: 7, kind: output, shape index: {}]  }
   0x1   :  { %12 = sst [smem:[#allocation3]] %s2638_s6 }
   0x2   :  { %13 = vsyncpa [#allocation5], 0  ;;  %s2223_s26 = smov 0  }
   0x3 LB: > { %s1733_s27 = sadd.s32 4294967295, %s2174_s26   ;;  %p1735_p0 = scmp.ge.s32.totalorder %s2174_s26, 1  ;;  %s2174_s26 = sphi %s2223_s26, %s19_s26  }
   0x4   : > { %p202_p1 = scmp.lt.s32.totalorder %s2174_s26, 3  ;;  %s2176_s28 = smov [#allocation4]  }
   0x5   : > { %s220_s29 = sshll.u32 %s2176_s28, 4  ;;  %p2237_p3 = scmp.eq.s32.totalorder %s1733_s27, 0  ;;  %s221_s29 = int_to_ptr.vmem [resolvable:$true] %s220_s29 }
   0x6   : > { %p2231_p2 = pnand %p1735_p0, %p202_p1  ;;  %s2136_s11 = scalar_lea.hbm %s2635_s3, 8192 }
   0x7   : > { %s2644_s6 = scalar_select %p2237_p3, 1, 0 }
   0x8   : > { %s2643_s30 = scalar_select %p2231_p2, 1, 0 }
   0x9   : > { %p1910_p4 = pneg %p2231_p2  ;;  %p2137_p6 = scmp.ne.s32.totalorder %s2635_s3, %s2136_s11 }
   0xa   : > { %p2143_p10 = scmp.lt.u32.totalorder %s2136_s11, %s2635_s3 }
   0xb   : > { %p2245_p5 = pnand %p2237_p3, %p1910_p4 }
   0xd   : > { %p2138_p7 = pneg %p2245_p5 }
   0xf   : > { %p2139_p8 = pnand %p2138_p7, %p2137_p6 }
  0x11   : > { %p2140_p9 = pneg %p2139_p8 }
  0x13   : > { %p2145_p11 = pnand %p2143_p10, %p2140_p9 }
  0x15   : > { %2148 = shalt.err (!%p2145_p11)
}
  0x16   : > { %s2149_s16 = scalar_lea.vmem %s221_s29, 8192  ;;  %p2157_p1 = scmp.lt.s32.totalorder %s221_s29, %s221_s29 }
  0x17   : > { %p2150_p12 = scmp.ne.s32.totalorder %s221_s29, %s2149_s16  ;;  %p2158_p4 = scmp.lt.s32.totalorder %s2149_s16, %s2149_s16 }
  0x19   : > { %p2152_p13 = pnand %p2150_p12, %p2138_p7  ;;  %p2159_p3 = por %p2158_p4, %p2157_p1 }
  0x1b   : > { %p2153_p0 = pneg %p2152_p13 }
  0x1d   : > { %p2160_p2 = pnand %p2159_p3, %p2153_p0 }
  0x1f   : > { %2163 = shalt.err (!%p2160_p2)
}
  0x20   : > { %s2177_s17 = smov 128   ;;  %s2178_s18 = smov 8  }
  0x21   : > { %1913 = dma.hbm_to_vmem [thread:$0]  (!%p2245_p5), %s2635_s3, 8192, %s221_s29, [#allocation5], %s2177_s17, %s2177_s17, %s2178_s18  }
  0x22   : > { %p2646_p6 = scmp.ne.s32.totalorder %s2643_s30, 0 }
  0x23   : > { %p2647_p8 = scmp.ne.s32.totalorder (!%p2646_p6), %s2644_s6, 0 }
  0x24   : > { %254 = sbr.rel (%p2646_p6) target bundleno = 736 (0x2e0), region = 48 }
  0x2b   : > { %2169 = dma.done.wait (%p2647_p8), [#allocation5], 8192  }
  0x2c   : > { %2171 = vsyncadd (%p2647_p8), [#allocation5], 4294959104  ;;  %v2179_v0 = vmov 0   ;;  %v1928_v1 = vld [vmem:[%s2633_s1 + $0x4] ss:$16 sps:$4 sm:$0xff]   ;;  %s1740_s9 = sshll.u32 %s1733_s27, 4 }
  0x2d   : > { %594 = vmatprep.mubr.bf16.mxu0 %v2179_v0  ;;  %299 = vst [vmem:[#allocation2] sm:$0xff] %v2179_v0  ;;  %300 = vst [vmem:[#allocation2 + $0x8] sm:$0xff] %v2179_v0  ;;  %707 = vmatprep.mubr.bf16.mxu1 %v2179_v0  ;;  %v1930_v2 = vld [vmem:[%s2633_s1 + $0xc] ss:$16 sps:$4 sm:$0xff]   ;;  %v1932_v3 = vld [vmem:[%s2633_s1] ss:$16 sps:$4 sm:$0xff]  }
  0x2e   : > { %301 = vst [vmem:[#allocation2 + $0x10] sm:$0xff] %v2179_v0  ;;  %302 = vst [vmem:[#allocation2 + $0x18] sm:$0xff] %v2179_v0  ;;  %562 = vmatprep.subr.bf16.mxu0 %v1928_v1  ;;  %v1933_v4 = vld [vmem:[%s2633_s1 + $0x8] ss:$16 sps:$4 sm:$0xff]   ;;  %675 = vmatprep.subr.bf16.mxu1 %v1930_v2  ;;  %v1934_v5 = vld [vmem:[%s2633_s1 + $0x24] ss:$16 sps:$4 sm:$0xff]  }
  0x2f   : > { %303 = vst [vmem:[#allocation2 + $0x20] sm:$0xff] %v2179_v0  ;;  %304 = vst [vmem:[#allocation2 + $0x28] sm:$0xff] %v2179_v0  ;;  %563 = vmatpush1.bf16.msra.mxu0 %v1932_v3  ;;  %676 = vmatpush1.bf16.msra.mxu1 %v1933_v4  ;;  %v1936_v6 = vld [vmem:[%s2633_s1 + $0x2c] ss:$16 sps:$4 sm:$0xff]   ;;  %v1938_v7 = vld [vmem:[%s2633_s1 + $0x20] ss:$16 sps:$4 sm:$0xff]  }
  0x30   : > { %305 = vst [vmem:[#allocation2 + $0x30] sm:$0xff] %v2179_v0  ;;  %306 = vst [vmem:[#allocation2 + $0x38] sm:$0xff] %v2179_v0  ;;  %564 = vmatprep.subr.bf16.mxu0 %v1934_v5  ;;  %v1939_v8 = vld [vmem:[%s2633_s1 + $0x28] ss:$16 sps:$4 sm:$0xff]   ;;  %677 = vmatprep.subr.bf16.mxu1 %v1936_v6  ;;  %v1940_v9 = vld [vmem:[%s2633_s1 + $0x44] ss:$16 sps:$4 sm:$0xff]  }
  0x31   : > { %p287_p2 = scmp.lt.s32.totalorder %s1740_s9, 31  ;;  %v1942_v10 = vld [vmem:[%s2633_s1 + $0x4c] ss:$16 sps:$4 sm:$0xff]   ;;  %v1944_v11 = vld [vmem:[%s2633_s1 + $0x40] ss:$16 sps:$4 sm:$0xff]   ;;  %vm331_vm0 = vcmask 31744  }
  0x32   : > { %v1945_v12 = vld [vmem:[%s2633_s1 + $0x48] ss:$16 sps:$4 sm:$0xff]   ;;  %v1946_v13 = vld [vmem:[%s2633_s1 + $0x64] ss:$16 sps:$4 sm:$0xff]   ;;  %v1948_v14 = vld [vmem:[%s2633_s1 + $0x6c] ss:$16 sps:$4 sm:$0xff]  }
  0x33   : > { %565 = vmatpush1.bf16.msra.mxu0 %v1938_v7  ;;  %678 = vmatpush1.bf16.msra.mxu1 %v1939_v8  ;;  %v1950_v15 = vld [vmem:[%s2633_s1 + $0x60] ss:$16 sps:$4 sm:$0xff]   ;;  %s2649_s9 = smov (!%p287_p2, %s1740_s9), 31  ;;  %v1951_v16 = vld [vmem:[%s2633_s1 + $0x68] ss:$16 sps:$4 sm:$0xff]   ;;  %s1630_s8 = sld [smem:[#allocation3]] }
  0x34   : > { %566 = vmatprep.subr.bf16.mxu0 %v1940_v9  ;;  %679 = vmatprep.subr.bf16.mxu1 %v1942_v10  ;;  %v1952_v17 = vld [vmem:[%s2633_s1 + $0x84] ss:$16 sps:$4 sm:$0xff]   ;;  %v1954_v18 = vld [vmem:[%s2633_s1 + $0x8c] ss:$16 sps:$4 sm:$0xff]   ;;  %v1956_v19 = vld [vmem:[%s2633_s1 + $0x80] ss:$16 sps:$4 sm:$0xff]  }
  0x35   : > { %v1957_v20 = vld [vmem:[%s2633_s1 + $0x88] ss:$16 sps:$4 sm:$0xff]   ;;  %s1741_s27 = sshll.u32 %s2649_s9, 3  ;;  %v1958_v21 = vld [vmem:[%s2633_s1 + $0xa4] ss:$16 sps:$4 sm:$0xff]   ;;  %vm1648_vm1 = vcmask 7168  }
  0x36   : > { %v1960_v22 = vld [vmem:[%s2633_s1 + $0xac] ss:$16 sps:$4 sm:$0xff]   ;;  %s2357_s24 = scalar_lea.vmem %s2632_s0, %s1741_s27  ;;  %v1962_v23 = vld [vmem:[%s2633_s1 + $0xa0] ss:$16 sps:$4 sm:$0xff]   ;;  %v1963_v24 = vld [vmem:[%s2633_s1 + $0xa8] ss:$16 sps:$4 sm:$0xff]   ;;  %s2595_s12 = scalar_lea.vmem %s2639_s7, %s1741_s27 }
  0x37   : > { %567 = vmatpush1.bf16.msra.mxu0 %v1944_v11  ;;  %680 = vmatpush1.bf16.msra.mxu1 %v1945_v12  ;;  %v1964_v25 = vld [vmem:[%s2633_s1 + $0xc4] ss:$16 sps:$4 sm:$0xff]   ;;  %v1966_v26 = vld [vmem:[%s2633_s1 + $0xcc] ss:$16 sps:$4 sm:$0xff]   ;;  %v1968_v29 = vld [vmem:[%s2633_s1 + $0xc0] ss:$16 sps:$4 sm:$0xff]  }
  0x38   : > { %568 = vmatprep.subr.bf16.mxu0 %v1946_v13  ;;  %681 = vmatprep.subr.bf16.mxu1 %v1948_v14  ;;  %v307_v27 = vld [vmem:[%s2357_s24] sm:$0xff]  ;;  %v308_v28 = vld [vmem:[%s2357_s24 + $0x8] sm:$0xff]  ;;  %v309_v32 = vld [vmem:[%s2357_s24 + $0x10] sm:$0xff] }
  0x39   : > { %v1969_v30 = vld [vmem:[%s2633_s1 + $0xc8] ss:$16 sps:$4 sm:$0xff]   ;;  %v323_v31 = vpack.c.bf16 %v308_v28, %v307_v27  ;;  %v311_v34 = vld [vmem:[%s2357_s24 + $0x20] sm:$0xff]  ;;  %v1972_v36 = vld [vmem:[%s2633_s1 + $0xec] ss:$16 sps:$4 sm:$0xff]  }
  0x3a   : > { %v310_v33 = vld [vmem:[%s2357_s24 + $0x18] sm:$0xff]  ;;  %v1970_v35 = vld [vmem:[%s2633_s1 + $0xe4] ss:$16 sps:$4 sm:$0xff]   ;;  %v312_v38 = vld [vmem:[%s2357_s24 + $0x28] sm:$0xff] }
  0x3b   : > { %569 = vmatpush1.bf16.msra.mxu0 %v1950_v15  ;;  %682 = vmatpush1.bf16.msra.mxu1 %v1951_v16  ;;  %v324_v37 = vpack.c.bf16 %v310_v33, %v309_v32  ;;  %v313_v39 = vld [vmem:[%s2357_s24 + $0x30] sm:$0xff]  ;;  %v314_v40 = vld [vmem:[%s2357_s24 + $0x38] sm:$0xff]  ;;  %332 = vst.msk [vmem:[#allocation2] sm:$0xff] %vm331_vm0, %v323_v31  ;;  %v325_v41 = vpack.c.bf16 %v312_v38, %v311_v34  ;;  %v315_v43 = vld [vmem:[%s2357_s24 + $0x40] sm:$0xff] }
  0x3c   : > { %570 = vmatprep.subr.bf16.mxu0 %v1952_v17  ;;  %683 = vmatprep.subr.bf16.mxu1 %v1954_v18  ;;  %v326_v42 = vpack.c.bf16 %v314_v40, %v313_v39  ;;  %v316_v44 = vld [vmem:[%s2357_s24 + $0x48] sm:$0xff]  ;;  %v317_v45 = vld [vmem:[%s2357_s24 + $0x50] sm:$0xff]  ;;  %v318_v47 = vld [vmem:[%s2357_s24 + $0x58] sm:$0xff] }
  0x3d   : > { %333 = vst.msk [vmem:[#allocation2 + $0x8] sm:$0xff] %vm331_vm0, %v324_v37  ;;  %v327_v46 = vpack.c.bf16 %v316_v44, %v315_v43  ;;  %v319_v48 = vld [vmem:[%s2357_s24 + $0x60] sm:$0xff]  ;;  %v320_v49 = vld [vmem:[%s2357_s24 + $0x68] sm:$0xff]  ;;  %334 = vst.msk [vmem:[#allocation2 + $0x10] sm:$0xff] %vm331_vm0, %v325_v41  ;;  %v328_v50 = vpack.c.bf16 %v318_v47, %v317_v45 }
  0x3e   : > { %335 = vst.msk [vmem:[#allocation2 + $0x18] sm:$0xff] %vm331_vm0, %v326_v42  ;;  %v329_v51 = vpack.c.bf16 %v320_v49, %v319_v48  ;;  %v321_v52 = vld [vmem:[%s2357_s24 + $0x70] sm:$0xff]  ;;  %v322_v53 = vld [vmem:[%s2357_s24 + $0x78] sm:$0xff]  ;;  %v1978_v57 = vld [vmem:[#allocation4 + $0x4] ss:$8 sps:$4 sm:$0xff]  }
  0x3f   : > { %571 = vmatpush1.bf16.msra.mxu0 %v1956_v19  ;;  %684 = vmatpush1.bf16.msra.mxu1 %v1957_v20  ;;  %v1974_v54 = vld [vmem:[%s2633_s1 + $0xe0] ss:$16 sps:$4 sm:$0xff]   ;;  %v1975_v55 = vld [vmem:[%s2633_s1 + $0xe8] ss:$16 sps:$4 sm:$0xff]   ;;  %336 = vst.msk [vmem:[#allocation2 + $0x20] sm:$0xff] %vm331_vm0, %v327_v46  ;;  %v330_v56 = vpack.c.bf16 %v322_v53, %v321_v52  ;;  %337 = vst.msk [vmem:[#allocation2 + $0x28] sm:$0xff] %vm331_vm0, %v328_v50 }
  0x40   : > { %572 = vmatprep.subr.bf16.mxu0 %v1958_v21  ;;  %685 = vmatprep.subr.bf16.mxu1 %v1960_v22  ;;  %338 = vst.msk [vmem:[#allocation2 + $0x30] sm:$0xff] %vm331_vm0, %v329_v51  ;;  %v1981_v58 = vld [vmem:[#allocation4 + $0x104] ss:$8 sps:$4 sm:$0xff]   ;;  %v1976_v60 = vld [vmem:[#allocation4] ss:$8 sps:$4 sm:$0xff]  }
  0x41   : > { %339 = vst.msk [vmem:[#allocation2 + $0x38] sm:$0xff] %vm331_vm0, %v330_v56  ;;  %v1979_v61 = vld [vmem:[#allocation4 + $0x100] ss:$8 sps:$4 sm:$0xff]   ;;  %v1984_v62 = vld [vmem:[#allocation4 + $0x14] ss:$8 sps:$4 sm:$0xff]  }
  0x42   : > { %v340_v59 = vld [vmem:[#allocation2] sm:$0xff]  ;;  %v1987_v63 = vld [vmem:[#allocation4 + $0x114] ss:$8 sps:$4 sm:$0xff]   ;;  %v1982_v1 = vld [vmem:[#allocation4 + $0x10] ss:$8 sps:$4 sm:$0xff]  }
  0x43   : > { %573 = vmatpush1.bf16.msra.mxu0 %v1962_v23  ;;  %686 = vmatpush1.bf16.msra.mxu1 %v1963_v24  ;;  %v1985_v2 = vld [vmem:[#allocation4 + $0x110] ss:$8 sps:$4 sm:$0xff]   ;;  %v1990_v3 = vld [vmem:[#allocation4 + $0x24] ss:$8 sps:$4 sm:$0xff]   ;;  %v1988_v6 = vld [vmem:[#allocation4 + $0x20] ss:$8 sps:$4 sm:$0xff]  }
  0x44   : > { %574 = vmatprep.subr.bf16.mxu0 %v1964_v25  ;;  %687 = vmatprep.subr.bf16.mxu1 %v1966_v26  ;;  %v1993_v4 = vld [vmem:[#allocation4 + $0x124] ss:$8 sps:$4 sm:$0xff]   ;;  %v1991_v7 = vld [vmem:[#allocation4 + $0x120] ss:$8 sps:$4 sm:$0xff]   ;;  %v1996_v8 = vld [vmem:[#allocation4 + $0x34] ss:$8 sps:$4 sm:$0xff]  }
  0x45   : > { %v341_v5 = vld [vmem:[#allocation2 + $0x8] sm:$0xff]  ;;  %v1999_v9 = vld [vmem:[#allocation4 + $0x134] ss:$8 sps:$4 sm:$0xff]   ;;  %v1994_v10 = vld [vmem:[#allocation4 + $0x30] ss:$8 sps:$4 sm:$0xff]  }
  0x46   : > { %v1997_v11 = vld [vmem:[#allocation4 + $0x130] ss:$8 sps:$4 sm:$0xff]   ;;  %v2002_v12 = vld [vmem:[#allocation4 + $0x44] ss:$8 sps:$4 sm:$0xff]   ;;  %v2000_v15 = vld [vmem:[#allocation4 + $0x40] ss:$8 sps:$4 sm:$0xff]  }
  0x47   : > { %575 = vmatpush1.bf16.msra.mxu0 %v1968_v29  ;;  %688 = vmatpush1.bf16.msra.mxu1 %v1969_v30  ;;  %v2005_v13 = vld [vmem:[#allocation4 + $0x144] ss:$8 sps:$4 sm:$0xff]   ;;  %v342_v14 = vld [vmem:[#allocation2 + $0x10] sm:$0xff]  ;;  %v2003_v16 = vld [vmem:[#allocation4 + $0x140] ss:$8 sps:$4 sm:$0xff]  }
  0x48   : > { %576 = vmatprep.subr.bf16.mxu0 %v1970_v35  ;;  %689 = vmatprep.subr.bf16.mxu1 %v1972_v36  ;;  %v2008_v17 = vld [vmem:[#allocation4 + $0x54] ss:$8 sps:$4 sm:$0xff]   ;;  %v2006_v19 = vld [vmem:[#allocation4 + $0x50] ss:$8 sps:$4 sm:$0xff]   ;;  %v2014_v21 = vld [vmem:[#allocation4 + $0x64] ss:$8 sps:$4 sm:$0xff]  }
  0x49   : > { %v2011_v18 = vld [vmem:[#allocation4 + $0x154] ss:$8 sps:$4 sm:$0xff]   ;;  %v2009_v20 = vld [vmem:[#allocation4 + $0x150] ss:$8 sps:$4 sm:$0xff]   ;;  %v2017_v22 = vld [vmem:[#allocation4 + $0x164] ss:$8 sps:$4 sm:$0xff]  }
  0x4a   : > { %v343_v23 = vld [vmem:[#allocation2 + $0x18] sm:$0xff]  ;;  %v2012_v24 = vld [vmem:[#allocation4 + $0x60] ss:$8 sps:$4 sm:$0xff]   ;;  %v2026_v30 = vld [vmem:[#allocation4 + $0x84] ss:$8 sps:$4 sm:$0xff]  }
  0x4b   : > { %577 = vmatpush1.bf16.msra.mxu0 %v1974_v54  ;;  %690 = vmatpush1.bf16.msra.mxu1 %v1975_v55  ;;  %v2015_v25 = vld [vmem:[#allocation4 + $0x160] ss:$8 sps:$4 sm:$0xff]   ;;  %v2020_v26 = vld [vmem:[#allocation4 + $0x74] ss:$8 sps:$4 sm:$0xff]   ;;  %v2018_v28 = vld [vmem:[#allocation4 + $0x70] ss:$8 sps:$4 sm:$0xff]  }
  0x4c   : > { %1280 = vmatprep.subr.bf16.mxu1 %v1978_v57  ;;  %1393 = vmatprep.subr.bf16.mxu0 %v1981_v58  ;;  %v2023_v27 = vld [vmem:[#allocation4 + $0x174] ss:$8 sps:$4 sm:$0xff]   ;;  %v2021_v29 = vld [vmem:[#allocation4 + $0x170] ss:$8 sps:$4 sm:$0xff]   ;;  %v2029_v31 = vld [vmem:[#allocation4 + $0x184] ss:$8 sps:$4 sm:$0xff]  }
  0x4d   : > { %v344_v32 = vld [vmem:[#allocation2 + $0x20] sm:$0xff]  ;;  %v2032_v35 = vld [vmem:[#allocation4 + $0x94] ss:$8 sps:$4 sm:$0xff]   ;;  %v2030_v37 = vld [vmem:[#allocation4 + $0x90] ss:$8 sps:$4 sm:$0xff]  }
  0x4e   : > { %595 = vmatmul.mubr.bf16.vlgmr.msra.gmra.mrb[0].mxu0 %v340_v59  ;;  %708 = vmatmul.mubr.bf16.vlgmr.msra.gmra.mrb[0].mxu1 %v340_v59  ;;  %v2024_v33 = vld [vmem:[#allocation4 + $0x80] ss:$8 sps:$4 sm:$0xff]   ;;  %v2035_v36 = vld [vmem:[#allocation4 + $0x194] ss:$8 sps:$4 sm:$0xff]   ;;  %v2033_v38 = vld [vmem:[#allocation4 + $0x190] ss:$8 sps:$4 sm:$0xff]  }
  0x4f   : > { %604 = vmatprep.mubr.bf16.mxu0 %v2179_v0  ;;  %717 = vmatprep.mubr.bf16.mxu1 %v2179_v0  ;;  %v2027_v34 = vld [vmem:[#allocation4 + $0x180] ss:$8 sps:$4 sm:$0xff]   ;;  %v2038_v39 = vld [vmem:[#allocation4 + $0xa4] ss:$8 sps:$4 sm:$0xff]   ;;  %v2044_v44 = vld [vmem:[#allocation4 + $0xb4] ss:$8 sps:$4 sm:$0xff]  }
  0x50   : > { %1281 = vmatpush1.bf16.msra.mxu1 %v1976_v60  ;;  %1394 = vmatpush1.bf16.msra.mxu0 %v1979_v61  ;;  %v2041_v40 = vld [vmem:[#allocation4 + $0x1a4] ss:$8 sps:$4 sm:$0xff]   ;;  %v2036_v42 = vld [vmem:[#allocation4 + $0xa0] ss:$8 sps:$4 sm:$0xff]   ;;  %v2047_v45 = vld [vmem:[#allocation4 + $0x1b4] ss:$8 sps:$4 sm:$0xff]  }
  0x51   : > { %1282 = vmatprep.subr.bf16.mxu1 %v1984_v62  ;;  %1395 = vmatprep.subr.bf16.mxu0 %v1987_v63  ;;  %v345_v41 = vld [vmem:[#allocation2 + $0x28] sm:$0xff]  ;;  %v2042_v46 = vld [vmem:[#allocation4 + $0xb0] ss:$8 sps:$4 sm:$0xff]   ;;  %v2056_v53 = vld [vmem:[#allocation4 + $0xd4] ss:$8 sps:$4 sm:$0xff]  }
  0x52   : > { %v2039_v43 = vld [vmem:[#allocation4 + $0x1a0] ss:$8 sps:$4 sm:$0xff]   ;;  %v2045_v47 = vld [vmem:[#allocation4 + $0x1b0] ss:$8 sps:$4 sm:$0xff]   ;;  %v2050_v48 = vld [vmem:[#allocation4 + $0xc4] ss:$8 sps:$4 sm:$0xff]  }
  0x53   : > { %v2053_v49 = vld [vmem:[#allocation4 + $0x1c4] ss:$8 sps:$4 sm:$0xff]   ;;  %v346_v50 = vld [vmem:[#allocation2 + $0x30] sm:$0xff]  ;;  %v2048_v51 = vld [vmem:[#allocation4 + $0xc0] ss:$8 sps:$4 sm:$0xff]  }
  0x54   : > { %1283 = vmatpush1.bf16.msra.mxu1 %v1982_v1  ;;  %1396 = vmatpush1.bf16.msra.mxu0 %v1985_v2  ;;  %v2051_v52 = vld [vmem:[#allocation4 + $0x1c0] ss:$8 sps:$4 sm:$0xff]   ;;  %v2059_v54 = vld [vmem:[#allocation4 + $0x1d4] ss:$8 sps:$4 sm:$0xff]   ;;  %v2054_v55 = vld [vmem:[#allocation4 + $0xd0] ss:$8 sps:$4 sm:$0xff]   ;;  %v382_v2 = vlaneseq }
  0x55   : > { %1284 = vmatprep.subr.bf16.mxu1 %v1990_v3  ;;  %1397 = vmatprep.subr.bf16.mxu0 %v1993_v4  ;;  %v2057_v56 = vld [vmem:[#allocation4 + $0x1d0] ss:$8 sps:$4 sm:$0xff]   ;;  %v2062_v58 = vld [vmem:[#allocation4 + $0xe4] ss:$8 sps:$4 sm:$0xff]   ;;  %v2060_v60 = vld [vmem:[#allocation4 + $0xe0] ss:$8 sps:$4 sm:$0xff]  }
  0x56   : > { %605 = vmatmul.mubr.bf16.gmra.mrb[4].mxu0 %v341_v5  ;;  %718 = vmatmul.mubr.bf16.gmra.mrb[4].mxu1 %v341_v5  ;;  %v347_v57 = vld [vmem:[#allocation2 + $0x38] sm:$0xff]  ;;  %v2065_v59 = vld [vmem:[#allocation4 + $0x1e4] ss:$8 sps:$4 sm:$0xff]   ;;  %v2063_v61 = vld [vmem:[#allocation4 + $0x1e0] ss:$8 sps:$4 sm:$0xff]   ;;  %v383_v3 = vshrl.u32 %v382_v2, 7 }
  0x57   : > { %614 = vmatprep.mubr.bf16.mxu0 %v2179_v0  ;;  %727 = vmatprep.mubr.bf16.mxu1 %v2179_v0  ;;  %v2071_v62 = vld [vmem:[#allocation4 + $0x1f4] ss:$8 sps:$4 sm:$0xff]   ;;  %v2066_v63 = vld [vmem:[#allocation4 + $0xf0] ss:$8 sps:$4 sm:$0xff]  }
  0x58   : > { %1285 = vmatpush1.bf16.msra.mxu1 %v1988_v6  ;;  %1398 = vmatpush1.bf16.msra.mxu0 %v1991_v7  ;;  %v2069_v1 = vld [vmem:[#allocation4 + $0x1f0] ss:$8 sps:$4 sm:$0xff]   ;;  %v2427_v4 = vsub.s32 0, %v383_v3  ;;  %v392_v5 = vsub.s32 2, %v383_v3  ;;  %v380_v6 = vld [vmem:[%s2634_s2] sm:$0xf] }
  0x59   : > { %1286 = vmatprep.subr.bf16.mxu1 %v1996_v8  ;;  %1399 = vmatprep.subr.bf16.mxu0 %v1999_v9  ;;  %v2432_v7 = vsub.s32 1, %v383_v3  ;;  %v396_v8 = vsub.s32 3, %v383_v3 }
  0x5a   : > { %v2435_v9 = vrot.slane %v380_v6, %v2427_v4 }
  0x5c   : > { %1287 = vmatpush1.bf16.msra.mxu1 %v1994_v10  ;;  %1400 = vmatpush1.bf16.msra.mxu0 %v1997_v11  ;;  %v2437_v10 = vrot.slane %v380_v6, %v392_v5  ;;  %v2440_v11 = vrot.slane %v380_v6, %v2432_v7 }
  0x5d   : > { %1288 = vmatprep.subr.bf16.mxu1 %v2002_v12  ;;  %1401 = vmatprep.subr.bf16.mxu0 %v2005_v13  ;;  %v2442_v12 = vrot.slane %v380_v6, %v396_v8 }
  0x5e   : > { %615 = vmatmul.mubr.bf16.gmra.mrb[8].mxu0 %v342_v14  ;;  %728 = vmatmul.mubr.bf16.gmra.mrb[8].mxu1 %v342_v14 }
  0x5f   : > { %624 = vmatprep.mubr.bf16.mxu0 %v2179_v0  ;;  %737 = vmatprep.mubr.bf16.mxu1 %v2179_v0 }
  0x60   : > { %1289 = vmatpush1.bf16.msra.mxu1 %v2000_v15  ;;  %1402 = vmatpush1.bf16.msra.mxu0 %v2003_v16 }
  0x61   : > { %1290 = vmatprep.subr.bf16.mxu1 %v2008_v17  ;;  %1403 = vmatprep.subr.bf16.mxu0 %v2011_v18 }
  0x64   : > { %1291 = vmatpush1.bf16.msra.mxu1 %v2006_v19  ;;  %1404 = vmatpush1.bf16.msra.mxu0 %v2009_v20 }
  0x65   : > { %1292 = vmatprep.subr.bf16.mxu1 %v2014_v21  ;;  %1405 = vmatprep.subr.bf16.mxu0 %v2017_v22 }
  0x66   : > { %625 = vmatmul.mubr.bf16.gmra.mrb[12].mxu0 %v343_v23  ;;  %738 = vmatmul.mubr.bf16.gmra.mrb[12].mxu1 %v343_v23 }
  0x67   : > { %634 = vmatprep.mubr.bf16.mxu0 %v2179_v0  ;;  %747 = vmatprep.mubr.bf16.mxu1 %v2179_v0 }
  0x68   : > { %1293 = vmatpush1.bf16.msra.mxu1 %v2012_v24  ;;  %1406 = vmatpush1.bf16.msra.mxu0 %v2015_v25 }
  0x69   : > { %1294 = vmatprep.subr.bf16.mxu1 %v2020_v26  ;;  %1407 = vmatprep.subr.bf16.mxu0 %v2023_v27 }
  0x6c   : > { %1295 = vmatpush1.bf16.msra.mxu1 %v2018_v28  ;;  %1408 = vmatpush1.bf16.msra.mxu0 %v2021_v29 }
  0x6d   : > { %1296 = vmatprep.subr.bf16.mxu1 %v2026_v30  ;;  %1409 = vmatprep.subr.bf16.mxu0 %v2029_v31 }
  0x6e   : > { %635 = vmatmul.mubr.bf16.gmra.mrb[16].mxu0 %v344_v32  ;;  %748 = vmatmul.mubr.bf16.gmra.mrb[16].mxu1 %v344_v32 }
  0x6f   : > { %644 = vmatprep.mubr.bf16.mxu0 %v2179_v0  ;;  %757 = vmatprep.mubr.bf16.mxu1 %v2179_v0 }
  0x70   : > { %1297 = vmatpush1.bf16.msra.mxu1 %v2024_v33  ;;  %1410 = vmatpush1.bf16.msra.mxu0 %v2027_v34 }
  0x71   : > { %1298 = vmatprep.subr.bf16.mxu1 %v2032_v35  ;;  %1411 = vmatprep.subr.bf16.mxu0 %v2035_v36 }
  0x74   : > { %1299 = vmatpush1.bf16.msra.mxu1 %v2030_v37  ;;  %1412 = vmatpush1.bf16.msra.mxu0 %v2033_v38 }
  0x75   : > { %1300 = vmatprep.subr.bf16.mxu1 %v2038_v39  ;;  %1413 = vmatprep.subr.bf16.mxu0 %v2041_v40 }
  0x76   : > { %645 = vmatmul.mubr.bf16.gmra.mrb[20].mxu0 %v345_v41  ;;  %758 = vmatmul.mubr.bf16.gmra.mrb[20].mxu1 %v345_v41 }
  0x77   : > { %654 = vmatprep.mubr.bf16.mxu0 %v2179_v0  ;;  %767 = vmatprep.mubr.bf16.mxu1 %v2179_v0 }
  0x78   : > { %1301 = vmatpush1.bf16.msra.mxu1 %v2036_v42  ;;  %1414 = vmatpush1.bf16.msra.mxu0 %v2039_v43 }
  0x79   : > { %1302 = vmatprep.subr.bf16.mxu1 %v2044_v44  ;;  %1415 = vmatprep.subr.bf16.mxu0 %v2047_v45 }
  0x7c   : > { %1303 = vmatpush1.bf16.msra.mxu1 %v2042_v46  ;;  %1416 = vmatpush1.bf16.msra.mxu0 %v2045_v47 }
  0x7d   : > { %1304 = vmatprep.subr.bf16.mxu1 %v2050_v48  ;;  %1417 = vmatprep.subr.bf16.mxu0 %v2053_v49 }
  0x7e   : > { %655 = vmatmul.mubr.bf16.gmra.mrb[24].mxu0 %v346_v50  ;;  %768 = vmatmul.mubr.bf16.gmra.mrb[24].mxu1 %v346_v50 }
  0x7f   : > { %664 = vmatprep.mubr.bf16.mxu0 %v2179_v0  ;;  %777 = vmatprep.mubr.bf16.mxu1 %v2179_v0  ;;  %v2068_v0 = vld [vmem:[#allocation4 + $0xf4] ss:$8 sps:$4 sm:$0xff]  }
  0x80   : > { %1305 = vmatpush1.bf16.msra.mxu1 %v2048_v51  ;;  %1418 = vmatpush1.bf16.msra.mxu0 %v2051_v52 }
  0x81   : > { %1306 = vmatprep.subr.bf16.mxu1 %v2056_v53  ;;  %1419 = vmatprep.subr.bf16.mxu0 %v2059_v54 }
  0x84   : > { %1307 = vmatpush1.bf16.msra.mxu1 %v2054_v55  ;;  %1420 = vmatpush1.bf16.msra.mxu0 %v2057_v56 }
  0x85   : > { %1308 = vmatprep.subr.bf16.mxu1 %v2062_v58  ;;  %1421 = vmatprep.subr.bf16.mxu0 %v2065_v59 }
  0x86   : > { %665 = vmatmul.mubr.bf16.gmra.mrb[28].mxu0 %v347_v57  ;;  %778 = vmatmul.mubr.bf16.gmra.mrb[28].mxu1 %v347_v57 }
  0x88   : > { %1309 = vmatpush1.bf16.msra.mxu1 %v2060_v60  ;;  %1422 = vmatpush1.bf16.msra.mxu0 %v2063_v61 }
  0x89   : > { %1310 = vmatprep.subr.bf16.mxu1 %v2068_v0  ;;  %1423 = vmatprep.subr.bf16.mxu0 %v2071_v62 }
  0x8c   : > { %1311 = vmatpush1.bf16.msra.mxu1 %v2066_v63  ;;  %1424 = vmatpush1.bf16.msra.mxu0 %v2069_v1 }
 0x121   : > { %v596_v13 = vpop.f32.mrb[0].mxu0  ;;  %v709_v14 = vpop.f32.mrb[0].mxu1 }
 0x122   : > { %v597_v15 = vadd.f32 %v596_v13, %v2435_v9  ;;  %v710_v16 = vadd.f32 %v709_v14, %v2437_v10  ;;  %v598_v17 = vpop.f32.mrb[1].mxu0  ;;  %v711_v18 = vpop.f32.mrb[1].mxu1 }
 0x123   : > { %v599_v19 = vadd.f32 %v598_v17, %v2440_v11  ;;  %v712_v20 = vadd.f32 %v711_v18, %v2442_v12  ;;  %v600_v21 = vpop.f32.mrb[2].mxu0  ;;  %v713_v22 = vpop.f32.mrb[2].mxu1 }
 0x124   : > { %v790_v23 = vmax.f32 %v710_v16, 0.0  ;;  %v601_v24 = vadd.f32 %v600_v21, %v2435_v9  ;;  %v714_v25 = vadd.f32 %v713_v22, %v2437_v10  ;;  %v602_v26 = vpop.f32.mrb[3].mxu0  ;;  %v715_v27 = vpop.f32.mrb[3].mxu1  ;;  %v788_v31 = vmax.f32 %v597_v15, 0.0 }
 0x125   : > { %v791_v28 = vmax.f32 %v712_v20, 0.0  ;;  %v603_v29 = vadd.f32 %v602_v26, %v2440_v11  ;;  %v716_v30 = vadd.f32 %v715_v27, %v2442_v12  ;;  %v789_v34 = vmax.f32 %v599_v19, 0.0 }
 0x126   : > { %v792_v32 = vmax.f32 %v601_v24, 0.0  ;;  %v794_v33 = vmax.f32 %v714_v25, 0.0 }
 0x127   : > { %v793_v35 = vmax.f32 %v603_v29, 0.0  ;;  %v795_v36 = vmax.f32 %v716_v30, 0.0 }
 0x128   : > { %v852_v37 = vpack.c.bf16 %v792_v32, %v788_v31  ;;  %v854_v38 = vpack.c.bf16 %v794_v33, %v790_v23 }
 0x129   : > { %v853_v39 = vpack.c.bf16 %v793_v35, %v789_v34  ;;  %v855_v40 = vpack.c.bf16 %v795_v36, %v791_v28  ;;  %v606_v41 = vpop.f32.mrb[4].mxu0  ;;  %v719_v42 = vpop.f32.mrb[4].mxu1 }
 0x12a   : > { %v607_v43 = vadd.f32 %v606_v41, %v2435_v9  ;;  %v720_v44 = vadd.f32 %v719_v42, %v2437_v10  ;;  %v608_v45 = vpop.f32.mrb[5].mxu0  ;;  %v721_v46 = vpop.f32.mrb[5].mxu1 }
 0x12b   : > { %v609_v47 = vadd.f32 %v608_v45, %v2440_v11  ;;  %v722_v48 = vadd.f32 %v721_v46, %v2442_v12  ;;  %v610_v49 = vpop.f32.mrb[6].mxu0  ;;  %v723_v50 = vpop.f32.mrb[6].mxu1  ;;  %1312 = vmatprep.mubr.bf16.mxu1 %v853_v39  ;;  %1425 = vmatprep.mubr.bf16.mxu0 %v855_v40 }
 0x12c   : > { %v798_v51 = vmax.f32 %v720_v44, 0.0  ;;  %v611_v52 = vadd.f32 %v610_v49, %v2435_v9  ;;  %v724_v53 = vadd.f32 %v723_v50, %v2437_v10  ;;  %v612_v54 = vpop.f32.mrb[7].mxu0  ;;  %v725_v55 = vpop.f32.mrb[7].mxu1  ;;  %1313 = vmatmul.mubr.bf16.vlgmr.msra.gmra.mrb[32].mxu1 %v852_v37  ;;  %1426 = vmatmul.mubr.bf16.vlgmr.msra.gmra.mrb[32].mxu0 %v854_v38  ;;  %v796_v59 = vmax.f32 %v607_v43, 0.0 }
 0x12d   : > { %v799_v56 = vmax.f32 %v722_v48, 0.0  ;;  %v613_v57 = vadd.f32 %v612_v54, %v2440_v11  ;;  %v726_v58 = vadd.f32 %v725_v55, %v2442_v12  ;;  %v797_v0 = vmax.f32 %v609_v47, 0.0 }
 0x12e   : > { %v800_v60 = vmax.f32 %v611_v52, 0.0  ;;  %v802_v61 = vmax.f32 %v724_v53, 0.0 }
 0x12f   : > { %v801_v62 = vmax.f32 %v613_v57, 0.0  ;;  %v803_v63 = vmax.f32 %v726_v58, 0.0 }
 0x130   : > { %v856_v1 = vpack.c.bf16 %v800_v60, %v796_v59  ;;  %v858_v2 = vpack.c.bf16 %v802_v61, %v798_v51 }
 0x131   : > { %v857_v3 = vpack.c.bf16 %v801_v62, %v797_v0  ;;  %v859_v5 = vpack.c.bf16 %v803_v63, %v799_v56  ;;  %v616_v6 = vpop.f32.mrb[8].mxu0  ;;  %v729_v8 = vpop.f32.mrb[8].mxu1 }
 0x132   : > { %v617_v13 = vadd.f32 %v616_v6, %v2435_v9  ;;  %v730_v14 = vadd.f32 %v729_v8, %v2437_v10  ;;  %v618_v15 = vpop.f32.mrb[9].mxu0  ;;  %v731_v16 = vpop.f32.mrb[9].mxu1 }
 0x133   : > { %v619_v17 = vadd.f32 %v618_v15, %v2440_v11  ;;  %v732_v18 = vadd.f32 %v731_v16, %v2442_v12  ;;  %v620_v19 = vpop.f32.mrb[10].mxu0  ;;  %v733_v20 = vpop.f32.mrb[10].mxu1  ;;  %1322 = vmatprep.mubr.bf16.mxu1 %v857_v3  ;;  %1435 = vmatprep.mubr.bf16.mxu0 %v859_v5 }
 0x134   : > { %v806_v21 = vmax.f32 %v730_v14, 0.0  ;;  %v621_v22 = vadd.f32 %v620_v19, %v2435_v9  ;;  %v734_v23 = vadd.f32 %v733_v20, %v2437_v10  ;;  %v622_v24 = vpop.f32.mrb[11].mxu0  ;;  %v735_v25 = vpop.f32.mrb[11].mxu1  ;;  %1323 = vmatmul.mubr.bf16.gmra.mrb[36].mxu1 %v856_v1  ;;  %1436 = vmatmul.mubr.bf16.gmra.mrb[36].mxu0 %v858_v2  ;;  %v804_v29 = vmax.f32 %v617_v13, 0.0 }
 0x135   : > { %v807_v26 = vmax.f32 %v732_v18, 0.0  ;;  %v623_v27 = vadd.f32 %v622_v24, %v2440_v11  ;;  %v736_v28 = vadd.f32 %v735_v25, %v2442_v12  ;;  %v805_v32 = vmax.f32 %v619_v17, 0.0 }
 0x136   : > { %v808_v30 = vmax.f32 %v621_v22, 0.0  ;;  %v810_v31 = vmax.f32 %v734_v23, 0.0 }
 0x137   : > { %v809_v33 = vmax.f32 %v623_v27, 0.0  ;;  %v811_v34 = vmax.f32 %v736_v28, 0.0 }
 0x138   : > { %v860_v35 = vpack.c.bf16 %v808_v30, %v804_v29  ;;  %v862_v36 = vpack.c.bf16 %v810_v31, %v806_v21 }
 0x139   : > { %v861_v37 = vpack.c.bf16 %v809_v33, %v805_v32  ;;  %v863_v38 = vpack.c.bf16 %v811_v34, %v807_v26  ;;  %v626_v39 = vpop.f32.mrb[12].mxu0  ;;  %v739_v40 = vpop.f32.mrb[12].mxu1 }
 0x13a   : > { %v627_v41 = vadd.f32 %v626_v39, %v2435_v9  ;;  %v740_v42 = vadd.f32 %v739_v40, %v2437_v10  ;;  %v628_v43 = vpop.f32.mrb[13].mxu0  ;;  %v741_v44 = vpop.f32.mrb[13].mxu1 }
 0x13b   : > { %v629_v45 = vadd.f32 %v628_v43, %v2440_v11  ;;  %v742_v46 = vadd.f32 %v741_v44, %v2442_v12  ;;  %v630_v47 = vpop.f32.mrb[14].mxu0  ;;  %v743_v48 = vpop.f32.mrb[14].mxu1  ;;  %1332 = vmatprep.mubr.bf16.mxu1 %v861_v37  ;;  %1445 = vmatprep.mubr.bf16.mxu0 %v863_v38 }
 0x13c   : > { %v814_v49 = vmax.f32 %v740_v42, 0.0  ;;  %v631_v50 = vadd.f32 %v630_v47, %v2435_v9  ;;  %v744_v51 = vadd.f32 %v743_v48, %v2437_v10  ;;  %v632_v52 = vpop.f32.mrb[15].mxu0  ;;  %v745_v53 = vpop.f32.mrb[15].mxu1  ;;  %1333 = vmatmul.mubr.bf16.gmra.mrb[40].mxu1 %v860_v35  ;;  %1446 = vmatmul.mubr.bf16.gmra.mrb[40].mxu0 %v862_v36  ;;  %v812_v57 = vmax.f32 %v627_v41, 0.0 }
 0x13d   : > { %v815_v54 = vmax.f32 %v742_v46, 0.0  ;;  %v633_v55 = vadd.f32 %v632_v52, %v2440_v11  ;;  %v746_v56 = vadd.f32 %v745_v53, %v2442_v12  ;;  %v813_v60 = vmax.f32 %v629_v45, 0.0 }
 0x13e   : > { %v816_v58 = vmax.f32 %v631_v50, 0.0  ;;  %v818_v59 = vmax.f32 %v744_v51, 0.0 }
 0x13f   : > { %v817_v61 = vmax.f32 %v633_v55, 0.0  ;;  %v819_v0 = vmax.f32 %v746_v56, 0.0 }
 0x140   : > { %v864_v62 = vpack.c.bf16 %v816_v58, %v812_v57  ;;  %v866_v63 = vpack.c.bf16 %v818_v59, %v814_v49 }
 0x141   : > { %v865_v1 = vpack.c.bf16 %v817_v61, %v813_v60  ;;  %v867_v2 = vpack.c.bf16 %v819_v0, %v815_v54  ;;  %v636_v3 = vpop.f32.mrb[16].mxu0  ;;  %v749_v5 = vpop.f32.mrb[16].mxu1 }
 0x142   : > { %v637_v6 = vadd.f32 %v636_v3, %v2435_v9  ;;  %v750_v8 = vadd.f32 %v749_v5, %v2437_v10  ;;  %v638_v13 = vpop.f32.mrb[17].mxu0  ;;  %v751_v14 = vpop.f32.mrb[17].mxu1 }
 0x143   : > { %v639_v15 = vadd.f32 %v638_v13, %v2440_v11  ;;  %v752_v16 = vadd.f32 %v751_v14, %v2442_v12  ;;  %v640_v17 = vpop.f32.mrb[18].mxu0  ;;  %v753_v18 = vpop.f32.mrb[18].mxu1  ;;  %1342 = vmatprep.mubr.bf16.mxu1 %v865_v1  ;;  %1455 = vmatprep.mubr.bf16.mxu0 %v867_v2 }
 0x144   : > { %v822_v19 = vmax.f32 %v750_v8, 0.0  ;;  %v641_v20 = vadd.f32 %v640_v17, %v2435_v9  ;;  %v754_v21 = vadd.f32 %v753_v18, %v2437_v10  ;;  %v642_v22 = vpop.f32.mrb[19].mxu0  ;;  %v755_v23 = vpop.f32.mrb[19].mxu1  ;;  %1343 = vmatmul.mubr.bf16.gmra.mrb[44].mxu1 %v864_v62  ;;  %1456 = vmatmul.mubr.bf16.gmra.mrb[44].mxu0 %v866_v63  ;;  %v820_v27 = vmax.f32 %v637_v6, 0.0 }
 0x145   : > { %v823_v24 = vmax.f32 %v752_v16, 0.0  ;;  %v643_v25 = vadd.f32 %v642_v22, %v2440_v11  ;;  %v756_v26 = vadd.f32 %v755_v23, %v2442_v12  ;;  %v821_v30 = vmax.f32 %v639_v15, 0.0 }
 0x146   : > { %v824_v28 = vmax.f32 %v641_v20, 0.0  ;;  %v826_v29 = vmax.f32 %v754_v21, 0.0 }
 0x147   : > { %v825_v31 = vmax.f32 %v643_v25, 0.0  ;;  %v827_v32 = vmax.f32 %v756_v26, 0.0 }
 0x148   : > { %v868_v33 = vpack.c.bf16 %v824_v28, %v820_v27  ;;  %v870_v34 = vpack.c.bf16 %v826_v29, %v822_v19 }
 0x149   : > { %v869_v35 = vpack.c.bf16 %v825_v31, %v821_v30  ;;  %v871_v36 = vpack.c.bf16 %v827_v32, %v823_v24  ;;  %v646_v37 = vpop.f32.mrb[20].mxu0  ;;  %v759_v38 = vpop.f32.mrb[20].mxu1 }
 0x14a   : > { %v647_v39 = vadd.f32 %v646_v37, %v2435_v9  ;;  %v760_v40 = vadd.f32 %v759_v38, %v2437_v10  ;;  %v648_v41 = vpop.f32.mrb[21].mxu0  ;;  %v761_v42 = vpop.f32.mrb[21].mxu1 }
 0x14b   : > { %v649_v43 = vadd.f32 %v648_v41, %v2440_v11  ;;  %v762_v44 = vadd.f32 %v761_v42, %v2442_v12  ;;  %v650_v45 = vpop.f32.mrb[22].mxu0  ;;  %v763_v46 = vpop.f32.mrb[22].mxu1  ;;  %1352 = vmatprep.mubr.bf16.mxu1 %v869_v35  ;;  %1465 = vmatprep.mubr.bf16.mxu0 %v871_v36 }
 0x14c   : > { %v830_v47 = vmax.f32 %v760_v40, 0.0  ;;  %v651_v48 = vadd.f32 %v650_v45, %v2435_v9  ;;  %v764_v49 = vadd.f32 %v763_v46, %v2437_v10  ;;  %v652_v50 = vpop.f32.mrb[23].mxu0  ;;  %v765_v51 = vpop.f32.mrb[23].mxu1  ;;  %1353 = vmatmul.mubr.bf16.gmra.mrb[48].mxu1 %v868_v33  ;;  %1466 = vmatmul.mubr.bf16.gmra.mrb[48].mxu0 %v870_v34  ;;  %v828_v55 = vmax.f32 %v647_v39, 0.0 }
 0x14d   : > { %v831_v52 = vmax.f32 %v762_v44, 0.0  ;;  %v653_v53 = vadd.f32 %v652_v50, %v2440_v11  ;;  %v766_v54 = vadd.f32 %v765_v51, %v2442_v12  ;;  %v829_v58 = vmax.f32 %v649_v43, 0.0 }
 0x14e   : > { %v832_v56 = vmax.f32 %v651_v48, 0.0  ;;  %v834_v57 = vmax.f32 %v764_v49, 0.0 }
 0x14f   : > { %v833_v59 = vmax.f32 %v653_v53, 0.0  ;;  %v835_v60 = vmax.f32 %v766_v54, 0.0 }
 0x150   : > { %v872_v61 = vpack.c.bf16 %v832_v56, %v828_v55  ;;  %v874_v0 = vpack.c.bf16 %v834_v57, %v830_v47 }
 0x151   : > { %v873_v62 = vpack.c.bf16 %v833_v59, %v829_v58  ;;  %v875_v63 = vpack.c.bf16 %v835_v60, %v831_v52  ;;  %v656_v1 = vpop.f32.mrb[24].mxu0  ;;  %v769_v2 = vpop.f32.mrb[24].mxu1 }
 0x152   : > { %v657_v3 = vadd.f32 %v656_v1, %v2435_v9  ;;  %v770_v5 = vadd.f32 %v769_v2, %v2437_v10  ;;  %v658_v6 = vpop.f32.mrb[25].mxu0  ;;  %v771_v8 = vpop.f32.mrb[25].mxu1 }
 0x153   : > { %v659_v13 = vadd.f32 %v658_v6, %v2440_v11  ;;  %v772_v14 = vadd.f32 %v771_v8, %v2442_v12  ;;  %v660_v15 = vpop.f32.mrb[26].mxu0  ;;  %v773_v16 = vpop.f32.mrb[26].mxu1  ;;  %1362 = vmatprep.mubr.bf16.mxu1 %v873_v62  ;;  %1475 = vmatprep.mubr.bf16.mxu0 %v875_v63 }
 0x154   : > { %v838_v17 = vmax.f32 %v770_v5, 0.0  ;;  %v661_v18 = vadd.f32 %v660_v15, %v2435_v9  ;;  %v774_v19 = vadd.f32 %v773_v16, %v2437_v10  ;;  %v662_v20 = vpop.f32.mrb[27].mxu0  ;;  %v775_v21 = vpop.f32.mrb[27].mxu1  ;;  %1363 = vmatmul.mubr.bf16.gmra.mrb[52].mxu1 %v872_v61  ;;  %1476 = vmatmul.mubr.bf16.gmra.mrb[52].mxu0 %v874_v0  ;;  %v836_v25 = vmax.f32 %v657_v3, 0.0 }
 0x155   : > { %v839_v22 = vmax.f32 %v772_v14, 0.0  ;;  %v663_v23 = vadd.f32 %v662_v20, %v2440_v11  ;;  %v776_v24 = vadd.f32 %v775_v21, %v2442_v12  ;;  %v837_v28 = vmax.f32 %v659_v13, 0.0 }
 0x156   : > { %v840_v26 = vmax.f32 %v661_v18, 0.0  ;;  %v842_v27 = vmax.f32 %v774_v19, 0.0 }
 0x157   : > { %v841_v29 = vmax.f32 %v663_v23, 0.0  ;;  %v843_v30 = vmax.f32 %v776_v24, 0.0 }
 0x158   : > { %v876_v31 = vpack.c.bf16 %v840_v26, %v836_v25  ;;  %v878_v32 = vpack.c.bf16 %v842_v27, %v838_v17  ;;  %v1538_v25 = vld [vmem:[%s2637_s5] sm:$0x3] }
 0x159   : > { %v877_v33 = vpack.c.bf16 %v841_v29, %v837_v28  ;;  %v879_v34 = vpack.c.bf16 %v843_v30, %v839_v22  ;;  %v666_v35 = vpop.f32.mrb[28].mxu0  ;;  %v779_v36 = vpop.f32.mrb[28].mxu1 }
 0x15a   : > { %v667_v37 = vadd.f32 %v666_v35, %v2435_v9  ;;  %v780_v38 = vadd.f32 %v779_v36, %v2437_v10  ;;  %v668_v39 = vpop.f32.mrb[29].mxu0  ;;  %v781_v40 = vpop.f32.mrb[29].mxu1  ;;  %v2529_v35 = vrot.slane %v1538_v25, %v2427_v4 }
 0x15b   : > { %v669_v41 = vadd.f32 %v668_v39, %v2440_v11  ;;  %v782_v42 = vadd.f32 %v781_v40, %v2442_v12  ;;  %v670_v43 = vpop.f32.mrb[30].mxu0  ;;  %v783_v44 = vpop.f32.mrb[30].mxu1  ;;  %1372 = vmatprep.mubr.bf16.mxu1 %v877_v33  ;;  %1485 = vmatprep.mubr.bf16.mxu0 %v879_v34 }
 0x15c   : > { %v846_v45 = vmax.f32 %v780_v38, 0.0  ;;  %v671_v46 = vadd.f32 %v670_v43, %v2435_v9  ;;  %v784_v47 = vadd.f32 %v783_v44, %v2437_v10  ;;  %v672_v48 = vpop.f32.mrb[31].mxu0  ;;  %v785_v49 = vpop.f32.mrb[31].mxu1  ;;  %1373 = vmatmul.mubr.bf16.gmra.mrb[56].mxu1 %v876_v31  ;;  %1486 = vmatmul.mubr.bf16.gmra.mrb[56].mxu0 %v878_v32  ;;  %v844_v53 = vmax.f32 %v667_v37, 0.0  ;;  %v948_v10 = vld [vmem:[%s2636_s4] sm:$0x3] }
 0x15d   : > { %v847_v50 = vmax.f32 %v782_v42, 0.0  ;;  %v673_v51 = vadd.f32 %v672_v48, %v2440_v11  ;;  %v786_v52 = vadd.f32 %v785_v49, %v2442_v12  ;;  %v845_v56 = vmax.f32 %v669_v41, 0.0 }
 0x15e   : > { %v848_v54 = vmax.f32 %v671_v46, 0.0  ;;  %v850_v55 = vmax.f32 %v784_v47, 0.0  ;;  %v2512_v11 = vrot.slane %v948_v10, %v2427_v4  ;;  %v2515_v12 = vrot.slane %v948_v10, %v2432_v7 }
 0x15f   : > { %v849_v57 = vmax.f32 %v673_v51, 0.0  ;;  %v851_v58 = vmax.f32 %v786_v52, 0.0  ;;  %v2532_v37 = vrot.slane %v1538_v25, %v2432_v7 }
 0x160   : > { %v880_v59 = vpack.c.bf16 %v848_v54, %v844_v53  ;;  %v882_v60 = vpack.c.bf16 %v850_v55, %v846_v45 }
 0x161   : > { %v881_v9 = vpack.c.bf16 %v849_v57, %v845_v56  ;;  %v883_v61 = vpack.c.bf16 %v851_v58, %v847_v50 }
 0x163   : > { %1382 = vmatprep.mubr.bf16.mxu1 %v881_v9  ;;  %1495 = vmatprep.mubr.bf16.mxu0 %v883_v61 }
 0x164   : > { %1383 = vmatmul.mubr.bf16.gmra.mrb[60].mxu1 %v880_v59  ;;  %1496 = vmatmul.mubr.bf16.gmra.mrb[60].mxu0 %v882_v60 }
 0x1ff   : > { %v1314_v0 = vpop.f32.mrb[32].mxu1  ;;  %v1427_v62 = vpop.f32.mrb[32].mxu0 }
 0x200   : > { %v1315_v63 = vadd.f32 %v1314_v0, %v2512_v11  ;;  %v1316_v1 = vpop.f32.mrb[33].mxu1  ;;  %v1429_v2 = vpop.f32.mrb[33].mxu0 }
 0x201   : > { %v1317_v3 = vadd.f32 %v1316_v1, %v2515_v12  ;;  %v1318_v5 = vpop.f32.mrb[34].mxu1  ;;  %v1431_v6 = vpop.f32.mrb[34].mxu0 }
 0x202   : > { %v1428_v8 = vadd.f32 %v1427_v62, %v1315_v63  ;;  %v1319_v13 = vadd.f32 %v1318_v5, %v2512_v11  ;;  %v1320_v14 = vpop.f32.mrb[35].mxu1  ;;  %v1433_v15 = vpop.f32.mrb[35].mxu0 }
 0x203   : > { %v1430_v16 = vadd.f32 %v1429_v2, %v1317_v3  ;;  %v1321_v17 = vadd.f32 %v1320_v14, %v2515_v12 }
 0x204   : > { %2072 = vtanh.f32 %v1428_v8  ;;  %v1432_v18 = vadd.f32 %v1431_v6, %v1319_v13 }
 0x205   : > { %2074 = vtanh.f32 %v1430_v16  ;;  %v1434_v19 = vadd.f32 %v1433_v15, %v1321_v17 }
 0x206   : > { %2076 = vtanh.f32 %v1432_v18 }
 0x207   : > { %2078 = vtanh.f32 %v1434_v19  ;;  %v1324_v20 = vpop.f32.mrb[36].mxu1  ;;  %v1437_v21 = vpop.f32.mrb[36].mxu0 }
 0x208   : > { %v1325_v22 = vadd.f32 %v1324_v20, %v2512_v11  ;;  %v1326_v23 = vpop.f32.mrb[37].mxu1  ;;  %v1439_v24 = vpop.f32.mrb[37].mxu0 }
 0x209   : > { %v1327_v26 = vadd.f32 %v1326_v23, %v2515_v12  ;;  %v1328_v27 = vpop.f32.mrb[38].mxu1  ;;  %v1441_v28 = vpop.f32.mrb[38].mxu0 }
 0x20a   : > { %v1438_v29 = vadd.f32 %v1437_v21, %v1325_v22  ;;  %v1329_v30 = vadd.f32 %v1328_v27, %v2512_v11  ;;  %v1330_v31 = vpop.f32.mrb[39].mxu1  ;;  %v1443_v32 = vpop.f32.mrb[39].mxu0 }
 0x20b   : > { %v1440_v33 = vadd.f32 %v1439_v24, %v1327_v26  ;;  %v1331_v34 = vadd.f32 %v1330_v31, %v2515_v12 }
 0x20c   : > { %2080 = vtanh.f32 %v1438_v29  ;;  %v1442_v36 = vadd.f32 %v1441_v28, %v1329_v30 }
 0x20d   : > { %2082 = vtanh.f32 %v1440_v33  ;;  %v1444_v38 = vadd.f32 %v1443_v32, %v1331_v34 }
 0x20e   : > { %v2073_v39 = vpop.eup %2072  ;;  %2084 = vtanh.f32 %v1442_v36 }
 0x20f   : > { %v2075_v40 = vpop.eup %2074  ;;  %2086 = vtanh.f32 %v1444_v38  ;;  %v1334_v41 = vpop.f32.mrb[40].mxu1  ;;  %v1550_v43 = vmul.f32 %v2073_v39, %v2529_v35 }
 0x210   : > { %v1447_v42 = vpop.f32.mrb[40].mxu0  ;;  %v2077_v44 = vpop.eup %2076  ;;  %v1335_v45 = vadd.f32 %v1334_v41, %v2512_v11  ;;  %v1551_v47 = vmul.f32 %v2075_v40, %v2532_v37 }
 0x211   : > { %v1336_v4 = vpop.f32.mrb[41].mxu1  ;;  %v1449_v46 = vpop.f32.mrb[41].mxu0  ;;  %v1552_v51 = vmul.f32 %v2077_v44, %v2529_v35 }
 0x212   : > { %v2079_v48 = vpop.eup %2078  ;;  %v1337_v7 = vadd.f32 %v1336_v4, %v2515_v12  ;;  %v1338_v49 = vpop.f32.mrb[42].mxu1  ;;  %v1448_v52 = vadd.f32 %v1447_v42, %v1335_v45  ;;  %v1582_v56 = vadd.f32 %v1551_v47, %v1550_v43 }
 0x213   : > { %v1451_v50 = vpop.f32.mrb[42].mxu0  ;;  %v1339_v53 = vadd.f32 %v1338_v49, %v2512_v11  ;;  %v1340_v54 = vpop.f32.mrb[43].mxu1  ;;  %v1553_v57 = vmul.f32 %v2079_v48, %v2532_v37 }
 0x214   : > { %v1453_v55 = vpop.f32.mrb[43].mxu0  ;;  %v1450_v58 = vadd.f32 %v1449_v46, %v1337_v7  ;;  %v1341_v59 = vadd.f32 %v1340_v54, %v2515_v12  ;;  %2088 = vtanh.f32 %v1448_v52  ;;  %1583 = vadd.xlane.f32.xlu0 %v1582_v56 }
 0x215   : > { %v1452_v60 = vadd.f32 %v1451_v50, %v1339_v53  ;;  %v1585_v9 = vadd.f32 %v1553_v57, %v1552_v51 }
 0x216   : > { %2090 = vtanh.f32 %v1450_v58  ;;  %v1454_v61 = vadd.f32 %v1453_v55, %v1341_v59  ;;  %v2081_v10 = vpop.eup %2080 }
 0x217   : > { %2092 = vtanh.f32 %v1452_v60  ;;  %v2083_v0 = vpop.eup %2082  ;;  %v1344_v62 = vpop.f32.mrb[44].mxu1  ;;  %v1554_v1 = vmul.f32 %v2081_v10, %v2529_v35 }
 0x218   : > { %2094 = vtanh.f32 %v1454_v61  ;;  %v1457_v63 = vpop.f32.mrb[44].mxu0  ;;  %v2085_v2 = vpop.eup %2084  ;;  %v1345_v3 = vadd.f32 %v1344_v62, %v2512_v11  ;;  %1586 = vadd.xlane.f32.xlu0 %v1585_v9  ;;  %v1555_v8 = vmul.f32 %v2083_v0, %v2532_v37 }
 0x219   : > { %v1346_v5 = vpop.f32.mrb[45].mxu1  ;;  %v1459_v6 = vpop.f32.mrb[45].mxu0  ;;  %v1556_v17 = vmul.f32 %v2085_v2, %v2529_v35 }
 0x21a   : > { %v2087_v13 = vpop.eup %2086  ;;  %v1347_v14 = vadd.f32 %v1346_v5, %v2515_v12  ;;  %v1348_v15 = vpop.f32.mrb[46].mxu1  ;;  %v1458_v18 = vadd.f32 %v1457_v63, %v1345_v3  ;;  %v1588_v22 = vadd.f32 %v1555_v8, %v1554_v1 }
 0x21b   : > { %v1461_v16 = vpop.f32.mrb[46].mxu0  ;;  %v1349_v19 = vadd.f32 %v1348_v15, %v2512_v11  ;;  %v1350_v20 = vpop.f32.mrb[47].mxu1  ;;  %v1557_v23 = vmul.f32 %v2087_v13, %v2532_v37 }
 0x21c   : > { %v1463_v21 = vpop.f32.mrb[47].mxu0  ;;  %v1460_v24 = vadd.f32 %v1459_v6, %v1347_v14  ;;  %v1351_v25 = vadd.f32 %v1350_v20, %v2515_v12  ;;  %2096 = vtanh.f32 %v1458_v18  ;;  %1589 = vadd.xlane.f32.xlu1 %v1588_v22 }
 0x21d   : > { %v1462_v26 = vadd.f32 %v1461_v16, %v1349_v19  ;;  %v1591_v27 = vadd.f32 %v1557_v23, %v1556_v17 }
 0x21e   : > { %2098 = vtanh.f32 %v1460_v24  ;;  %v1464_v28 = vadd.f32 %v1463_v21, %v1351_v25  ;;  %v2089_v29 = vpop.eup %2088 }
 0x21f   : > { %2100 = vtanh.f32 %v1462_v26  ;;  %v1354_v31 = vpop.f32.mrb[48].mxu1  ;;  %v1467_v32 = vpop.f32.mrb[48].mxu0  ;;  %v1558_v33 = vmul.f32 %v2089_v29, %v2529_v35 }
 0x220   : > { %v2091_v30 = vpop.eup %2090  ;;  %2102 = vtanh.f32 %v1464_v28  ;;  %v1355_v36 = vadd.f32 %v1354_v31, %v2512_v11  ;;  %v1356_v38 = vpop.f32.mrb[49].mxu1  ;;  %1592 = vadd.xlane.f32.xlu1 %v1591_v27 }
 0x221   : > { %v2093_v34 = vpop.eup %2092  ;;  %v1469_v39 = vpop.f32.mrb[49].mxu0  ;;  %v1559_v40 = vmul.f32 %v2091_v30, %v2532_v37  ;;  %v1357_v42 = vadd.f32 %v1356_v38, %v2515_v12 }
 0x222   : > { %v2095_v41 = vpop.eup %2094  ;;  %v1358_v43 = vpop.f32.mrb[50].mxu1  ;;  %v1560_v45 = vmul.f32 %v2093_v34, %v2529_v35  ;;  %v1468_v4 = vadd.f32 %v1467_v32, %v1355_v36 }
 0x223   : > { %v1471_v44 = vpop.f32.mrb[50].mxu0  ;;  %v1359_v46 = vadd.f32 %v1358_v43, %v2512_v11  ;;  %v1360_v47 = vpop.f32.mrb[51].mxu1  ;;  %v1594_v7 = vadd.f32 %v1559_v40, %v1558_v33  ;;  %v1561_v49 = vmul.f32 %v2095_v41, %v2532_v37  ;;  %v1470_v50 = vadd.f32 %v1469_v39, %v1357_v42 }
 0x224   : > { %v1473_v48 = vpop.f32.mrb[51].mxu0  ;;  %v1361_v51 = vadd.f32 %v1360_v47, %v2515_v12  ;;  %2104 = vtanh.f32 %v1468_v4 }
 0x225   : > { %v1472_v52 = vadd.f32 %v1471_v44, %v1359_v46  ;;  %1595 = vadd.xlane.f32.xlu0 %v1594_v7  ;;  %v1597_v53 = vadd.f32 %v1561_v49, %v1560_v45  ;;  %2106 = vtanh.f32 %v1470_v50 }
 0x226   : > { %v1474_v54 = vadd.f32 %v1473_v48, %v1361_v51  ;;  %v2097_v55 = vpop.eup %2096 }
 0x227   : > { %2108 = vtanh.f32 %v1472_v52  ;;  %1598 = vadd.xlane.f32.xlu1 %v1597_v53  ;;  %v1364_v57 = vpop.f32.mrb[52].mxu1  ;;  %v1477_v58 = vpop.f32.mrb[52].mxu0  ;;  %v1562_v59 = vmul.f32 %v2097_v55, %v2529_v35 }
 0x228   : > { %v2099_v56 = vpop.eup %2098  ;;  %2110 = vtanh.f32 %v1474_v54  ;;  %v1365_v9 = vadd.f32 %v1364_v57, %v2512_v11  ;;  %v1366_v61 = vpop.f32.mrb[53].mxu1 }
 0x229   : > { %v2101_v60 = vpop.eup %2100  ;;  %v1479_v10 = vpop.f32.mrb[53].mxu0  ;;  %v1563_v0 = vmul.f32 %v2099_v56, %v2532_v37  ;;  %v1367_v63 = vadd.f32 %v1366_v61, %v2515_v12 }
 0x22a   : > { %v2103_v62 = vpop.eup %2102  ;;  %v1368_v1 = vpop.f32.mrb[54].mxu1  ;;  %v1564_v3 = vmul.f32 %v2101_v60, %v2529_v35  ;;  %v1478_v5 = vadd.f32 %v1477_v58, %v1365_v9 }
 0x22b   : > { %v1481_v2 = vpop.f32.mrb[54].mxu0  ;;  %v1369_v6 = vadd.f32 %v1368_v1, %v2512_v11  ;;  %v1370_v8 = vpop.f32.mrb[55].mxu1  ;;  %v1600_v14 = vadd.f32 %v1563_v0, %v1562_v59  ;;  %v1565_v15 = vmul.f32 %v2103_v62, %v2532_v37  ;;  %v1480_v16 = vadd.f32 %v1479_v10, %v1367_v63 }
 0x22c   : > { %v1483_v13 = vpop.f32.mrb[55].mxu0  ;;  %v1371_v17 = vadd.f32 %v1370_v8, %v2515_v12  ;;  %2112 = vtanh.f32 %v1478_v5 }
 0x22d   : > { %v1482_v18 = vadd.f32 %v1481_v2, %v1369_v6  ;;  %1601 = vadd.xlane.f32.xlu0 %v1600_v14  ;;  %v1603_v19 = vadd.f32 %v1565_v15, %v1564_v3  ;;  %2114 = vtanh.f32 %v1480_v16 }
 0x22e   : > { %v1484_v20 = vadd.f32 %v1483_v13, %v1371_v17  ;;  %v2105_v21 = vpop.eup %2104 }
 0x22f   : > { %2116 = vtanh.f32 %v1482_v18  ;;  %1604 = vadd.xlane.f32.xlu1 %v1603_v19  ;;  %v2107_v22 = vpop.eup %2106  ;;  %v1374_v23 = vpop.f32.mrb[56].mxu1  ;;  %v1566_v25 = vmul.f32 %v2105_v21, %v2529_v35 }
 0x230   : > { %2118 = vtanh.f32 %v1484_v20  ;;  %v1487_v24 = vpop.f32.mrb[56].mxu0  ;;  %v1375_v27 = vadd.f32 %v1374_v23, %v2512_v11  ;;  %v1376_v28 = vpop.f32.mrb[57].mxu1  ;;  %v1567_v30 = vmul.f32 %v2107_v22, %v2532_v37 }
 0x231   : > { %v2109_v26 = vpop.eup %2108  ;;  %v1489_v29 = vpop.f32.mrb[57].mxu0  ;;  %v1377_v32 = vadd.f32 %v1376_v28, %v2515_v12 }
 0x232   : > { %v2111_v31 = vpop.eup %2110  ;;  %v1378_v33 = vpop.f32.mrb[58].mxu1  ;;  %v1568_v36 = vmul.f32 %v2109_v26, %v2529_v35  ;;  %v1488_v38 = vadd.f32 %v1487_v24, %v1375_v27  ;;  %v1606_v42 = vadd.f32 %v1567_v30, %v1566_v25 }
 0x233   : > { %v1491_v34 = vpop.f32.mrb[58].mxu0  ;;  %v1379_v39 = vadd.f32 %v1378_v33, %v2512_v11  ;;  %v1380_v40 = vpop.f32.mrb[59].mxu1  ;;  %v1569_v43 = vmul.f32 %v2111_v31, %v2532_v37  ;;  %v1490_v44 = vadd.f32 %v1489_v29, %v1377_v32  ;;  %v1631_v31 = vstv %s1630_s8 }
 0x234   : > { %v1493_v41 = vpop.f32.mrb[59].mxu0  ;;  %v1381_v45 = vadd.f32 %v1380_v40, %v2515_v12  ;;  %2120 = vtanh.f32 %v1488_v38  ;;  %1607 = vadd.xlane.f32.xlu0 %v1606_v42 }
 0x235   : > { %v1492_v4 = vadd.f32 %v1491_v34, %v1379_v39  ;;  %v1609_v46 = vadd.f32 %v1569_v43, %v1568_v36  ;;  %2122 = vtanh.f32 %v1490_v44 }
 0x236   : > { %v1494_v47 = vadd.f32 %v1493_v41, %v1381_v45  ;;  %v2113_v48 = vpop.eup %2112 }
 0x237   : > { %2124 = vtanh.f32 %v1492_v4  ;;  %1610 = vadd.xlane.f32.xlu1 %v1609_v46  ;;  %v2115_v7 = vpop.eup %2114  ;;  %v1384_v49 = vpop.f32.mrb[60].mxu1  ;;  %v1570_v51 = vmul.f32 %v2113_v48, %v2529_v35 }
 0x238   : > { %2126 = vtanh.f32 %v1494_v47  ;;  %v1497_v50 = vpop.f32.mrb[60].mxu0  ;;  %v1385_v53 = vadd.f32 %v1384_v49, %v2512_v11  ;;  %v1386_v54 = vpop.f32.mrb[61].mxu1  ;;  %v1571_v56 = vmul.f32 %v2115_v7, %v2532_v37 }
 0x239   : > { %v2117_v52 = vpop.eup %2116  ;;  %v1499_v55 = vpop.f32.mrb[61].mxu0  ;;  %v1387_v58 = vadd.f32 %v1386_v54, %v2515_v12 }
 0x23a   : > { %v2119_v57 = vpop.eup %2118  ;;  %v1388_v59 = vpop.f32.mrb[62].mxu1  ;;  %v1572_v9 = vmul.f32 %v2117_v52, %v2529_v35  ;;  %v1498_v61 = vadd.f32 %v1497_v50, %v1385_v53  ;;  %v1612_v63 = vadd.f32 %v1571_v56, %v1570_v51 }
 0x23b   : > { %v1501_v60 = vpop.f32.mrb[62].mxu0  ;;  %v1389_v10 = vadd.f32 %v1388_v59, %v2512_v11  ;;  %v1390_v0 = vpop.f32.mrb[63].mxu1  ;;  %v1573_v1 = vmul.f32 %v2119_v57, %v2532_v37  ;;  %v1500_v2 = vadd.f32 %v1499_v55, %v1387_v58 }
 0x23c   : > { %v1503_v62 = vpop.f32.mrb[63].mxu0  ;;  %v1391_v3 = vadd.f32 %v1390_v0, %v2515_v12  ;;  %2128 = vtanh.f32 %v1498_v61  ;;  %1613 = vadd.xlane.f32.xlu0 %v1612_v63 }
 0x23d   : > { %v1502_v5 = vadd.f32 %v1501_v60, %v1389_v10  ;;  %v1615_v6 = vadd.f32 %v1573_v1, %v1572_v9  ;;  %2130 = vtanh.f32 %v1500_v2 }
 0x23e   : > { %v1504_v8 = vadd.f32 %v1503_v62, %v1391_v3  ;;  %v2121_v13 = vpop.eup %2120 }
 0x23f   : > { %2132 = vtanh.f32 %v1502_v5  ;;  %1616 = vadd.xlane.f32.xlu1 %v1615_v6  ;;  %v2123_v14 = vpop.eup %2122  ;;  %v1574_v11 = vmul.f32 %v2121_v13, %v2529_v35 }
 0x240   : > { %2134 = vtanh.f32 %v1504_v8  ;;  %v1575_v16 = vmul.f32 %v2123_v14, %v2532_v37 }
 0x241   : > { %v2125_v15 = vpop.eup %2124 }
 0x242   : > { %v2127_v17 = vpop.eup %2126  ;;  %v1576_v18 = vmul.f32 %v2125_v15, %v2529_v35  ;;  %v1618_v12 = vadd.f32 %v1575_v16, %v1574_v11 }
 0x243   : > { %v1577_v19 = vmul.f32 %v2127_v17, %v2532_v37 }
 0x244   : > { %1619 = vadd.xlane.f32.xlu0 %v1618_v12 }
 0x245   : > { %v1621_v20 = vadd.f32 %v1577_v19, %v1576_v18 }
 0x246   : > { %v2129_v21 = vpop.eup %2128 }
 0x247   : > { %1622 = vadd.xlane.f32.xlu1 %v1621_v20  ;;  %v2131_v22 = vpop.eup %2130  ;;  %v1578_v23 = vmul.f32 %v2129_v21, %v2529_v35 }
 0x248   : > { %v1579_v25 = vmul.f32 %v2131_v22, %v2532_v37 }
 0x249   : > { %v2133_v24 = vpop.eup %2132 }
 0x24a   : > { %v2135_v26 = vpop.eup %2134  ;;  %v1580_v27 = vmul.f32 %v2133_v24, %v2529_v35  ;;  %v1624_v28 = vadd.f32 %v1579_v25, %v1578_v23 }
 0x24b   : > { %v1581_v29 = vmul.f32 %v2135_v26, %v2532_v37 }
 0x24c   : > { %1625 = vadd.xlane.f32.xlu0 %v1624_v28 }
 0x24d   : > { %v1627_v30 = vadd.f32 %v1581_v29, %v1580_v27 }
 0x24f   : > { %1628 = vadd.xlane.f32.xlu1 %v1627_v30 }
 0x2a1   : > { %v1584_v35 = vpop.xlane.xlu0 %1583 }
 0x2a2   : > { %v1632_v32 = vadd.f32 %v1631_v31, %v1584_v35 }
 0x2a4   : > { %1649 = vst.msk [vmem:[%s2595_s12] sm:$0xff] %vm1648_vm1, %v1632_v32 }
 0x2a5   : > { %v1587_v37 = vpop.xlane.xlu0 %1586 }
 0x2a6   : > { %v1633_v33 = vadd.f32 %v1631_v31, %v1587_v37 }
 0x2a8   : > { %1650 = vst.msk [vmem:[%s2595_s12 + $0x8] sm:$0xff] %vm1648_vm1, %v1633_v33 }
 0x2a9   : > { %v1590_v34 = vpop.xlane.xlu1 %1589 }
 0x2aa   : > { %v1634_v36 = vadd.f32 %v1631_v31, %v1590_v34 }
 0x2ac   : > { %1651 = vst.msk [vmem:[%s2595_s12 + $0x10] sm:$0xff] %vm1648_vm1, %v1634_v36 }
 0x2ad   : > { %v1593_v38 = vpop.xlane.xlu1 %1592 }
 0x2ae   : > { %v1635_v39 = vadd.f32 %v1631_v31, %v1593_v38 }
 0x2b0   : > { %1652 = vst.msk [vmem:[%s2595_s12 + $0x18] sm:$0xff] %vm1648_vm1, %v1635_v39 }
 0x2b2   : > { %v1596_v40 = vpop.xlane.xlu0 %1595 }
 0x2b3   : > { %v1636_v41 = vadd.f32 %v1631_v31, %v1596_v40 }
 0x2b4   : > { %v1599_v42 = vpop.xlane.xlu1 %1598 }
 0x2b5   : > { %1653 = vst.msk [vmem:[%s2595_s12 + $0x20] sm:$0xff] %vm1648_vm1, %v1636_v41  ;;  %v1637_v43 = vadd.f32 %v1631_v31, %v1599_v42 }
 0x2b7   : > { %1654 = vst.msk [vmem:[%s2595_s12 + $0x28] sm:$0xff] %vm1648_vm1, %v1637_v43 }
 0x2ba   : > { %v1602_v44 = vpop.xlane.xlu0 %1601 }
 0x2bb   : > { %v1638_v45 = vadd.f32 %v1631_v31, %v1602_v44 }
 0x2bc   : > { %v1605_v4 = vpop.xlane.xlu1 %1604 }
 0x2bd   : > { %1655 = vst.msk [vmem:[%s2595_s12 + $0x30] sm:$0xff] %vm1648_vm1, %v1638_v45  ;;  %v1639_v46 = vadd.f32 %v1631_v31, %v1605_v4 }
 0x2bf   : > { %1656 = vst.msk [vmem:[%s2595_s12 + $0x38] sm:$0xff] %vm1648_vm1, %v1639_v46 }
 0x2c1   : > { %v1608_v47 = vpop.xlane.xlu0 %1607 }
 0x2c2   : > { %v1640_v48 = vadd.f32 %v1631_v31, %v1608_v47 }
 0x2c4   : > { %v1611_v7 = vpop.xlane.xlu1 %1610  ;;  %1657 = vst.msk [vmem:[%s2595_s12 + $0x40] sm:$0xff] %vm1648_vm1, %v1640_v48 }
 0x2c5   : > { %v1641_v49 = vadd.f32 %v1631_v31, %v1611_v7 }
 0x2c7   : > { %1658 = vst.msk [vmem:[%s2595_s12 + $0x48] sm:$0xff] %vm1648_vm1, %v1641_v49 }
 0x2c9   : > { %v1614_v50 = vpop.xlane.xlu0 %1613 }
 0x2ca   : > { %v1642_v51 = vadd.f32 %v1631_v31, %v1614_v50 }
 0x2cc   : > { %v1617_v52 = vpop.xlane.xlu1 %1616  ;;  %1659 = vst.msk [vmem:[%s2595_s12 + $0x50] sm:$0xff] %vm1648_vm1, %v1642_v51 }
 0x2cd   : > { %v1643_v53 = vadd.f32 %v1631_v31, %v1617_v52 }
 0x2cf   : > { %1660 = vst.msk [vmem:[%s2595_s12 + $0x58] sm:$0xff] %vm1648_vm1, %v1643_v53 }
 0x2d1   : > { %v1620_v54 = vpop.xlane.xlu0 %1619 }
 0x2d2   : > { %v1644_v55 = vadd.f32 %v1631_v31, %v1620_v54 }
 0x2d4   : > { %v1623_v56 = vpop.xlane.xlu1 %1622  ;;  %1661 = vst.msk [vmem:[%s2595_s12 + $0x60] sm:$0xff] %vm1648_vm1, %v1644_v55 }
 0x2d5   : > { %v1645_v57 = vadd.f32 %v1631_v31, %v1623_v56 }
 0x2d7   : > { %1662 = vst.msk [vmem:[%s2595_s12 + $0x68] sm:$0xff] %vm1648_vm1, %v1645_v57 }
 0x2d9   : > { %v1626_v58 = vpop.xlane.xlu0 %1625 }
 0x2da   : > { %v1646_v59 = vadd.f32 %v1631_v31, %v1626_v58 }
 0x2dc   : > { %v1629_v60 = vpop.xlane.xlu1 %1628  ;;  %1663 = vst.msk [vmem:[%s2595_s12 + $0x70] sm:$0xff] %vm1648_vm1, %v1646_v59 }
 0x2dd   : > { %v1647_v9 = vadd.f32 %v1631_v31, %v1629_v60 }
 0x2df   : > { %1664 = vst.msk [vmem:[%s2595_s12 + $0x78] sm:$0xff] %vm1648_vm1, %v1647_v9 }
 0x2e0 PF: > { %s19_s26 = sadd.s32 1, %s2174_s26  }
 0x2e1   : > { %p16_p3 = scmp.ge.s32.totalorder %s19_s26, 4  }
 0x2e3   :  { %18 = sbr.rel (!%p16_p3) target bundleno = 3 (0x3), region = 83 }
 0x2ea   :  { %1687 = vsyncpa [#allocation5], 1 }
 0x2eb   :  { %1689 = vsyncpa [#allocation5 + $0x1], 1 }

</bundles_post_ra>
